<compile_context>
chip_gen: v7x
topology: tpu7x:2x2x1
jax: 0.10.0
libtpu: 0.0.40
codegen_flags: <defaults>
</compile_context>

<pallas_src>
import math
import functools

import jax
import jax.numpy as jnp
from jax import lax
from jax.experimental import pallas as pl
from jax.experimental.pallas import tpu as pltpu

LN_EPS = 1e-5  # PyTorch nn.LayerNorm default


# ----------------------------- shared helpers --------------------------------
def _layernorm(x, w, b):
    mu = jnp.mean(x, axis=-1, keepdims=True)
    var = jnp.mean((x - mu) ** 2, axis=-1, keepdims=True)
    return (x - mu) * lax.rsqrt(var + LN_EPS) * w + b


# ------------------------------- fused kernel ---------------------------------
def fused_transformer_kernel(
    x_ref,                      # (Bt*T, H)  f32  embed-LN'd activations (read at layer 0)
    wqkv_ref, bqkv_ref,         # (H, 3H) bf16 (q-part pre-scaled), (1, 3H) f32
    wo_ref, bo_ref,             # (H, H) bf16 (rows head-major), (1, H) f32
    ln1w_ref, ln1b_ref,         # (1, H) f32
    w1_ref, b1_ref,             # (H, FF) bf16, (1, FF) f32
    w2_ref, b2_ref,             # (FF, H) bf16, (1, H) f32
    ln2w_ref, ln2b_ref,         # (1, H) f32
    o_ref,                      # (Bt*T, H) f32 : activation carried across the layer axis
    *, num_heads, bt, seq_t,
):
    layer = pl.program_id(1)

    # Layer 0: seed the VMEM-resident carry with the embed-LN'd sequence.
    @pl.when(layer == 0)
    def _():
        o_ref[...] = x_ref[...]

    x = o_ref[...]                                   # (Bt*T, H) float32
    H = x.shape[1]
    nh = num_heads
    hd = H // nh
    T = seq_t

    # ---- fused lane-dense QKV projection: one (Bt*T,H)@(H,3H) MXU pass (bf16) ----
    xb = x.astype(jnp.bfloat16)
    qkv = jnp.dot(xb, wqkv_ref[...], preferred_element_type=jnp.float32) + bqkv_ref[...]

    def split_heads(mat, col0):
        # (Bt*T, 3H) columns [col0, col0+H) -> (Bt*nh, T, hd); static 2D slices +
        # leading-axis concat only (no lane-dim reshapes / rank-4 transposes).
        pieces = []
        for b_i in range(bt):
            r0 = b_i * T
            for h in range(nh):
                c0 = col0 + h * hd
                pieces.append(mat[r0:r0 + T, c0:c0 + hd][None])
        return pieces[0] if len(pieces) == 1 else jnp.concatenate(pieces, axis=0)

    qh = split_heads(qkv, 0).astype(jnp.bfloat16)         # (Bt*nh, T, hd)
    kh = split_heads(qkv, H).astype(jnp.bfloat16)
    vh = split_heads(qkv, 2 * H).astype(jnp.bfloat16)

    # ---- scores + causal mask + softmax (f32 statistics) ----
    s = jnp.einsum("bqd,bkd->bqk", qh, kh,
                   preferred_element_type=jnp.float32)     # (Bt*nh, T, T)
    row = lax.broadcasted_iota(jnp.int32, (T, T), 0)
    col = lax.broadcasted_iota(jnp.int32, (T, T), 1)
    s = jnp.where((row >= col)[None, :, :], s, jnp.float32(-1e30))
    s = s - jnp.max(s, axis=-1, keepdims=True)
    p = jnp.exp(s)
    p = p * pl.reciprocal(jnp.sum(p, axis=-1, keepdims=True), approx=True)

    ctx = jnp.einsum("bqk,bkd->bqd", p.astype(jnp.bfloat16), vh,
                     preferred_element_type=jnp.float32)   # (Bt*nh, T, hd)

    # ---- merge heads back to lane-dense (Bt*T, H) and do ONE output projection ----
    rows = []
    for b_i in range(bt):
        rows.append(jnp.concatenate([ctx[b_i * nh + h] for h in range(nh)], axis=-1))
    ctx2d = rows[0] if bt == 1 else jnp.concatenate(rows, axis=0)   # (Bt*T, H)
    attn = jnp.dot(ctx2d.astype(jnp.bfloat16), wo_ref[...],
                   preferred_element_type=jnp.float32) + bo_ref[...]

    # residual + LayerNorm 1 (dropout p=0 -> identity)
    x1 = _layernorm(x + attn, ln1w_ref[...], ln1b_ref[...])

    # ---- MLP: Linear -> GELU(exact erf) -> Linear (bf16 matmuls, f32 accum) ----
    h1 = jnp.dot(x1.astype(jnp.bfloat16), w1_ref[...],
                 preferred_element_type=jnp.float32) + b1_ref[...]
    h1 = 0.5 * h1 * (1.0 + lax.erf(h1 * (1.0 / math.sqrt(2.0))))
    h2 = jnp.dot(h1.astype(jnp.bfloat16), w2_ref[...],
                 preferred_element_type=jnp.float32) + b2_ref[...]

    # residual + LayerNorm 2 + NaN guard (out[isnan(out)] = 0 in the reference)
    x2 = _layernorm(x1 + h2, ln2w_ref[...], ln2b_ref[...])
    o_ref[...] = jnp.where(jnp.isnan(x2), jnp.float32(0.0), x2)


# ------------------------------- wrapper --------------------------------------
def _pick_batch_block(B, max_bt=4):
    # Largest Bt dividing B that still leaves >= 2 parallel grid steps (megacore).
    bt = 1
    for cand in range(min(max_bt, B), 0, -1):
        if B % cand == 0 and B // cand >= 2:
            bt = cand
            break
    return bt


def pallas_transformer_stack(seq_emb, stacked, num_heads, *, bt=None):
    B, T, H = seq_emb.shape
    L = stacked["wqkv"].shape[0]
    FF = stacked["w1"].shape[2]
    nh = num_heads
    if bt is None:
        bt = _pick_batch_block(B)

    x_flat = seq_emb.reshape(B * T, H)

    kernel = functools.partial(fused_transformer_kernel, num_heads=nh, bt=bt, seq_t=T)

    def per_layer(*dims):
        n = len(dims)
        return pl.BlockSpec((None,) + dims, lambda b, l: (l,) + (0,) * n)

    # Explicit VMEM budget: 2x (double-buffered) per-layer bf16 weights + f32 biases,
    # the double-buffered activation blocks, and the attention/MLP intermediates, with
    # 2x headroom, capped at 64 MiB (v7x physical VMEM).
    # TODO(synk): at very large H/FF, tile the FF axis or use pipeline_mode=pl.Buffered(1)
    # on w1/w2 to stay under the v7x 64 MiB budget.
    wbytes = 2 * (3 * H * H + H * H + 2 * H * FF) + 4 * (9 * H + FF)
    abytes = 4 * bt * T * H * 4
    ibytes = 4 * (bt * T * (4 * H + FF) + 2 * bt * nh * T * T)
    est = 2 * wbytes + abytes + ibytes
    vmem_limit = int(min(64 * 2**20, max(32 * 2**20, 2 * est)))

    out_flat = pl.pallas_call(
        kernel,
        out_shape=jax.ShapeDtypeStruct((B * T, H), jnp.float32),
        grid=(B // bt, L),
        in_specs=[
            pl.BlockSpec((bt * T, H), lambda b, l: (b, 0)),   # activations (layer-0 init)
            per_layer(H, 3 * H), per_layer(1, 3 * H),          # fused Wqkv / bqkv
            per_layer(H, H), per_layer(1, H),                  # Wo (head-major rows), bo
            per_layer(1, H), per_layer(1, H),                  # ln1
            per_layer(H, FF), per_layer(1, FF),                # mlp fc1
            per_layer(FF, H), per_layer(1, H),                 # mlp fc2
            per_layer(1, H), per_layer(1, H),                  # ln2
        ],
        out_specs=pl.BlockSpec((bt * T, H), lambda b, l: (b, 0)),
        compiler_params=pltpu.CompilerParams(
            dimension_semantics=("parallel", "arbitrary"),
            vmem_limit_bytes=vmem_limit,
        ),
    )(
        x_flat,
        stacked["wqkv"], stacked["bqkv"],
        stacked["wo"], stacked["bo"],
        stacked["ln1w"], stacked["ln1b"],
        stacked["w1"], stacked["b1"],
        stacked["w2"], stacked["b2"],
        stacked["ln2w"], stacked["ln2b"],
    )
    return out_flat.reshape(B, T, H)


# --------------------------- model-level glue (JAX) ----------------------------
def time_embedding(timesteps, hidden_dim):
    # AbsolutePositionalEncoding: interleaved [sin, cos, sin, cos, ...]
    _2i = jnp.arange(0, hidden_dim, 2, dtype=jnp.float32)
    ang = timesteps[..., None] / jnp.power(10000.0, _2i / hidden_dim)  # (B, S, H/2)
    even = jnp.sin(ang)
    odd = jnp.cos(ang)
    return jnp.stack([even, odd], axis=-1).reshape(timesteps.shape + (hidden_dim,))


def _prepare_stacked_weights(blocks, hidden_dim, num_heads):
    """Stack per-layer weights for the fused kernel.

    Keeps Wqkv fused as one pre-transposed (H, 3H) tensor, folds the 1/sqrt(head_dim)
    softmax scale into the q columns, and pre-casts matmul weights to bfloat16
    (biases / LayerNorm params stay f32)."""
    H = hidden_dim
    hd = H // num_heads
    scale = 1.0 / math.sqrt(hd)

    wqkv, bqkv = [], []
    for blk in blocks:
        w = blk["wqkv"]                                   # (H, 3H), columns = [q | k | v]
        b = blk["bqkv"]                                   # (1, 3H)
        w = jnp.concatenate([w[:, :H] * scale, w[:, H:]], axis=1)
        b = jnp.concatenate([b[:, :H] * scale, b[:, H:]], axis=1)
        wqkv.append(w.astype(jnp.bfloat16))
        bqkv.append(b.astype(jnp.float32))

    def stack(key, dtype=jnp.float32):
        return jnp.stack([blk[key] for blk in blocks]).astype(dtype)

    return {
        "wqkv": jnp.stack(wqkv), "bqkv": jnp.stack(bqkv),
        "wo": stack("wo", jnp.bfloat16), "bo": stack("bo"),
        "ln1w": stack("ln1w"), "ln1b": stack("ln1b"),
        "w1": stack("w1", jnp.bfloat16), "b1": stack("b1"),
        "w2": stack("w2", jnp.bfloat16), "b2": stack("b2"),
        "ln2w": stack("ln2w"), "ln2b": stack("ln2b"),
    }


def transformer_forward(params, states, actions, rewards, timesteps, num_heads):
    B, S = states.shape
    H = params["state_emb"].shape[1]

    # TODO(synk): embedding-table lookups and sin/cos positional encodings stay in JAX glue.
    t_emb = time_embedding(timesteps.astype(jnp.float32), H)             # (B, S, H)
    s_emb = params["state_emb"][states] + t_emb
    a_emb = params["action_emb"][actions] + t_emb
    r_emb = rewards @ params["reward_w_t"] + params["reward_b"] + t_emb   # (B,S,1)@(1,H)

    # interleave (s_0, a_0, r_0, s_1, a_1, r_1, ...)
    seq = jnp.stack([s_emb, a_emb, r_emb], axis=1)                        # (B, 3, S, H)
    seq = jnp.transpose(seq, (0, 2, 1, 3)).reshape(B, 3 * S, H)

    # embed LayerNorm in plain XLA (cheap) -> removes two kernel input streams and the
    # in-kernel layer-0 LN work.
    seq = _layernorm(seq, params["embed_ln_w"], params["embed_ln_b"])

    # pad the token axis to a multiple of 8 (TPU sublane); padded keys are killed by
    # the causal mask, padded query rows are sliced off below.
    T = 3 * S
    Tp = ((T + 7) // 8) * 8
    if Tp != T:
        seq = jnp.pad(seq, ((0, 0), (0, Tp - T), (0, 0)))

    stacked = _prepare_stacked_weights(params["blocks"], H, num_heads)

    # one fused Pallas call: all transformer blocks, activation stays in VMEM
    out = pallas_transformer_stack(seq, stacked, num_heads)

    # Final action head kept in plain XLA: output lane width (action_dim=6) is far
    # below a 128-lane vreg, so a Pallas call would be masked-store + launch overhead.
    state_tokens = out[:, :T][:, 0::3]                                    # (B, S, H)
    return state_tokens @ params["head_w_t"] + params["head_b"]


def init_params(key, state_dim, action_dim, hidden_dim, feedforward_dim, num_blocks):
    keys = jax.random.split(key, 4 + num_blocks)

    def normal(k, shape):
        return (0.02 * jax.random.normal(k, shape)).astype(jnp.float32)

    params = {
        "state_emb": normal(keys[0], (state_dim, hidden_dim)),
        "action_emb": normal(keys[1], (action_dim, hidden_dim)),
        "reward_w_t": normal(keys[2], (1, hidden_dim)),   # Linear(1, H) weight, transposed
        "reward_b": jnp.zeros((hidden_dim,), jnp.float32),
        "embed_ln_w": jnp.ones((1, hidden_dim), jnp.float32),
        "embed_ln_b": jnp.zeros((1, hidden_dim), jnp.float32),
        "head_w_t": normal(keys[3], (hidden_dim, action_dim)),
        "head_b": jnp.zeros((1, action_dim), jnp.float32),
        "blocks": [],
    }
    for i in range(num_blocks):
        bk = jax.random.split(keys[4 + i], 4)
        params["blocks"].append({
            "wqkv": normal(bk[0], (hidden_dim, 3 * hidden_dim)),   # pre-transposed, [q|k|v]
            "bqkv": jnp.zeros((1, 3 * hidden_dim), jnp.float32),
            "wo": normal(bk[1], (hidden_dim, hidden_dim)),         # pre-transposed out_proj
            "bo": jnp.zeros((1, hidden_dim), jnp.float32),
            "ln1w": jnp.ones((1, hidden_dim), jnp.float32),
            "ln1b": jnp.zeros((1, hidden_dim), jnp.float32),
            "w1": normal(bk[2], (hidden_dim, feedforward_dim)),
            "b1": jnp.zeros((1, feedforward_dim), jnp.float32),
            "w2": normal(bk[3], (feedforward_dim, hidden_dim)),
            "b2": jnp.zeros((1, hidden_dim), jnp.float32),
            "ln2w": jnp.ones((1, hidden_dim), jnp.float32),
            "ln2b": jnp.zeros((1, hidden_dim), jnp.float32),
        })
    return params


if __name__ == "__main__":
    # Small config consistent with the module's forward.
    STATE_DIM, ACTION_DIM = 10, 6
    HIDDEN, FF = 32, 64
    SEQ, BATCH = 8, 2
    NUM_BLOCKS, NUM_HEADS = 2, 4

    key = jax.random.PRNGKey(0)
    k_p, k_s, k_a, k_r = jax.random.split(key, 4)
    params = init_params(k_p, STATE_DIM, ACTION_DIM, HIDDEN, FF, NUM_BLOCKS)

    states = jax.random.randint(k_s, (BATCH, SEQ), 0, STATE_DIM, dtype=jnp.int32)
    actions = jax.random.randint(k_a, (BATCH, SEQ), 0, ACTION_DIM, dtype=jnp.int32)
    rewards = jax.random.normal(k_r, (BATCH, SEQ, 1), dtype=jnp.float32)
    timesteps = jnp.broadcast_to(
        jnp.arange(SEQ, dtype=jnp.float32)[None, :], (BATCH, SEQ)
    )

    fwd = jax.jit(functools.partial(transformer_forward, num_heads=NUM_HEADS))
    out = fwd(params, states, actions, rewards, timesteps)
    out = jax.block_until_ready(out)
    assert out.shape == (BATCH, SEQ, ACTION_DIM), out.shape
    assert bool(jnp.all(jnp.isfinite(out)))
    print("KERNEL_OK")
</pallas_src>

<mosaic_0001>
module attributes {stable_mosaic.version = 11 : i64} {
  func.func @fused_transformer_kernel(%arg0: i32, %arg1: i32, %arg2: memref<24x32xf32, #tpu.memory_space<vmem>>, %arg3: memref<1x32x96xbf16, #tpu.memory_space<vmem>>, %arg4: memref<1x1x96xf32, #tpu.memory_space<vmem>>, %arg5: memref<1x32x32xbf16, #tpu.memory_space<vmem>>, %arg6: memref<1x1x32xf32, #tpu.memory_space<vmem>>, %arg7: memref<1x1x32xf32, #tpu.memory_space<vmem>>, %arg8: memref<1x1x32xf32, #tpu.memory_space<vmem>>, %arg9: memref<1x32x64xbf16, #tpu.memory_space<vmem>>, %arg10: memref<1x1x64xf32, #tpu.memory_space<vmem>>, %arg11: memref<1x64x32xbf16, #tpu.memory_space<vmem>>, %arg12: memref<1x1x32xf32, #tpu.memory_space<vmem>>, %arg13: memref<1x1x32xf32, #tpu.memory_space<vmem>>, %arg14: memref<1x1x32xf32, #tpu.memory_space<vmem>>, %arg15: memref<24x32xf32, #tpu.memory_space<vmem>>) attributes {dimension_semantics = [#tpu.dimension_semantics<parallel>, #tpu.dimension_semantics<arbitrary>], iteration_bounds = array<i64: 2, 2>, scalar_prefetch = 0 : i64, scratch_operands = 0 : i64, tpu.core_type = #tpu.core_type<tc>, window_params = [{transform_indices = @transform_0, window_bounds = array<i64: 24, 32>}, {transform_indices = @transform_1, window_bounds = array<i64: 1, 32, 96>}, {transform_indices = @transform_2, window_bounds = array<i64: 1, 1, 96>}, {transform_indices = @transform_3, window_bounds = array<i64: 1, 32, 32>}, {transform_indices = @transform_4, window_bounds = array<i64: 1, 1, 32>}, {transform_indices = @transform_5, window_bounds = array<i64: 1, 1, 32>}, {transform_indices = @transform_6, window_bounds = array<i64: 1, 1, 32>}, {transform_indices = @transform_7, window_bounds = array<i64: 1, 32, 64>}, {transform_indices = @transform_8, window_bounds = array<i64: 1, 1, 64>}, {transform_indices = @transform_9, window_bounds = array<i64: 1, 64, 32>}, {transform_indices = @transform_10, window_bounds = array<i64: 1, 1, 32>}, {transform_indices = @transform_11, window_bounds = array<i64: 1, 1, 32>}, {transform_indices = @transform_12, window_bounds = array<i64: 1, 1, 32>}, {transform_indices = @transform_13, window_bounds = array<i64: 24, 32>}]} {
    %c0_i32 = arith.constant 0 : i32
    %0 = arith.cmpi eq, %arg1, %c0_i32 : i32
    %1 = arith.extui %0 : i1 to i32
    %c0_i32_0 = arith.constant 0 : i32
    %2 = arith.cmpi ne, %1, %c0_i32_0 : i32
    scf.if %2 {
      %c0_62 = arith.constant 0 : index
      %c0_63 = arith.constant 0 : index
      %162 = vector.load %arg2[%c0_62, %c0_63] : memref<24x32xf32, #tpu.memory_space<vmem>>, vector<24x32xf32>
      %c0_64 = arith.constant 0 : index
      %c0_65 = arith.constant 0 : index
      %163 = vector.load %arg15[%c0_64, %c0_65] : memref<24x32xf32, #tpu.memory_space<vmem>>, vector<24x32xf32>
      tpu.vector_store %arg15[%c0_64, %c0_65], %162 {strides = array<i32>} : memref<24x32xf32, #tpu.memory_space<vmem>>, vector<24x32xf32>,
    } else {
    }
    %c0 = arith.constant 0 : index
    %c0_1 = arith.constant 0 : index
    %3 = vector.load %arg15[%c0, %c0_1] : memref<24x32xf32, #tpu.memory_space<vmem>>, vector<24x32xf32>
    %4 = arith.truncf %3 : vector<24x32xf32> to vector<24x32xbf16>
    %c0_2 = arith.constant 0 : index
    %c0_3 = arith.constant 0 : index
    %c0_4 = arith.constant 0 : index
    %5 = vector.load %arg3[%c0_2, %c0_3, %c0_4] : memref<1x32x96xbf16, #tpu.memory_space<vmem>>, vector<1x32x96xbf16>
    %6 = vector.shape_cast %5 : vector<1x32x96xbf16> to vector<32x96xbf16>
    %cst = arith.constant dense<0.000000e+00> : vector<24x96xf32>
    %7 = tpu.matmul %4, %6, %cst {dimension_numbers = #tpu.dot_dimension_numbers<[1], [0], [0], [1], [0, 0, 1, 1], [], []>} : vector<24x32xbf16>, vector<32x96xbf16>, vector<24x96xf32> -> vector<24x96xf32>
    %c0_5 = arith.constant 0 : index
    %c0_6 = arith.constant 0 : index
    %c0_7 = arith.constant 0 : index
    %8 = vector.load %arg4[%c0_5, %c0_6, %c0_7] : memref<1x1x96xf32, #tpu.memory_space<vmem>>, vector<1x1x96xf32>
    %9 = vector.shape_cast %8 : vector<1x1x96xf32> to vector<1x96xf32>
    %10 = vector.broadcast %9 : vector<1x96xf32> to vector<24x96xf32>
    %11 = arith.addf %7, %10 : vector<24x96xf32>
    %12 = vector.extract_strided_slice %11 {offsets = [0, 0], sizes = [24, 8], strides = [1, 1]} : vector<24x96xf32> to vector<24x8xf32>
    %13 = vector.shape_cast %12 : vector<24x8xf32> to vector<1x24x8xf32>
    %14 = vector.extract_strided_slice %11 {offsets = [0, 8], sizes = [24, 8], strides = [1, 1]} : vector<24x96xf32> to vector<24x8xf32>
    %15 = vector.shape_cast %14 : vector<24x8xf32> to vector<1x24x8xf32>
    %16 = vector.extract_strided_slice %11 {offsets = [0, 16], sizes = [24, 8], strides = [1, 1]} : vector<24x96xf32> to vector<24x8xf32>
    %17 = vector.shape_cast %16 : vector<24x8xf32> to vector<1x24x8xf32>
    %18 = vector.extract_strided_slice %11 {offsets = [0, 24], sizes = [24, 8], strides = [1, 1]} : vector<24x96xf32> to vector<24x8xf32>
    %19 = vector.shape_cast %18 : vector<24x8xf32> to vector<1x24x8xf32>
    %20 = tpu.concatenate %13, %15, %17, %19 in 0 : vector<1x24x8xf32>, vector<1x24x8xf32>, vector<1x24x8xf32>, vector<1x24x8xf32> -> vector<4x24x8xf32>
    %21 = arith.truncf %20 : vector<4x24x8xf32> to vector<4x24x8xbf16>
    %22 = vector.extract_strided_slice %11 {offsets = [0, 32], sizes = [24, 8], strides = [1, 1]} : vector<24x96xf32> to vector<24x8xf32>
    %23 = vector.shape_cast %22 : vector<24x8xf32> to vector<1x24x8xf32>
    %24 = vector.extract_strided_slice %11 {offsets = [0, 40], sizes = [24, 8], strides = [1, 1]} : vector<24x96xf32> to vector<24x8xf32>
    %25 = vector.shape_cast %24 : vector<24x8xf32> to vector<1x24x8xf32>
    %26 = vector.extract_strided_slice %11 {offsets = [0, 48], sizes = [24, 8], strides = [1, 1]} : vector<24x96xf32> to vector<24x8xf32>
    %27 = vector.shape_cast %26 : vector<24x8xf32> to vector<1x24x8xf32>
    %28 = vector.extract_strided_slice %11 {offsets = [0, 56], sizes = [24, 8], strides = [1, 1]} : vector<24x96xf32> to vector<24x8xf32>
    %29 = vector.shape_cast %28 : vector<24x8xf32> to vector<1x24x8xf32>
    %30 = tpu.concatenate %23, %25, %27, %29 in 0 : vector<1x24x8xf32>, vector<1x24x8xf32>, vector<1x24x8xf32>, vector<1x24x8xf32> -> vector<4x24x8xf32>
    %31 = arith.truncf %30 : vector<4x24x8xf32> to vector<4x24x8xbf16>
    %32 = vector.extract_strided_slice %11 {offsets = [0, 64], sizes = [24, 8], strides = [1, 1]} : vector<24x96xf32> to vector<24x8xf32>
    %33 = vector.shape_cast %32 : vector<24x8xf32> to vector<1x24x8xf32>
    %34 = vector.extract_strided_slice %11 {offsets = [0, 72], sizes = [24, 8], strides = [1, 1]} : vector<24x96xf32> to vector<24x8xf32>
    %35 = vector.shape_cast %34 : vector<24x8xf32> to vector<1x24x8xf32>
    %36 = vector.extract_strided_slice %11 {offsets = [0, 80], sizes = [24, 8], strides = [1, 1]} : vector<24x96xf32> to vector<24x8xf32>
    %37 = vector.shape_cast %36 : vector<24x8xf32> to vector<1x24x8xf32>
    %38 = vector.extract_strided_slice %11 {offsets = [0, 88], sizes = [24, 8], strides = [1, 1]} : vector<24x96xf32> to vector<24x8xf32>
    %39 = vector.shape_cast %38 : vector<24x8xf32> to vector<1x24x8xf32>
    %40 = tpu.concatenate %33, %35, %37, %39 in 0 : vector<1x24x8xf32>, vector<1x24x8xf32>, vector<1x24x8xf32>, vector<1x24x8xf32> -> vector<4x24x8xf32>
    %41 = arith.truncf %40 : vector<4x24x8xf32> to vector<4x24x8xbf16>
    "tpu.trace_start"() <{level = 10 : i32, message = "bqd,bkd->bqk"}> : () -> ()
    %cst_8 = arith.constant dense<0.000000e+00> : vector<4x24x24xf32>
    %42 = tpu.matmul %21, %31, %cst_8 {dimension_numbers = #tpu.dot_dimension_numbers<[2], [2], [1], [1], [0, 0, 0, 1, 1, 1], [0], [0]>} : vector<4x24x8xbf16>, vector<4x24x8xbf16>, vector<4x24x24xf32> -> vector<4x24x24xf32>
    "tpu.trace_stop"() : () -> ()
    %43 = tpu.iota {dimensions = array<i32: 0>} : vector<24x24xi32>
    %44 = tpu.iota {dimensions = array<i32: 1>} : vector<24x24xi32>
    %45 = arith.cmpi sge, %43, %44 : vector<24x24xi32>
    %46 = vector.shape_cast %45 : vector<24x24xi1> to vector<1x24x24xi1>
    %cst_9 = arith.constant -1.000000e+30 : f32
    %47 = vector.shape_cast %46 : vector<1x24x24xi1> to vector<1x24x24xi1>
    %48 = vector.broadcast %47 : vector<1x24x24xi1> to vector<4x24x24xi1>
    %49 = vector.broadcast %cst_9 : f32 to vector<4x24x24xf32>
    %50 = arith.select %48, %42, %49 : vector<4x24x24xi1>, vector<4x24x24xf32>
    %cst_10 = arith.constant dense<0xFF800000> : vector<4x24xf32>
    %51 = vector.multi_reduction <maximumf>, %50, %cst_10 [2] : vector<4x24x24xf32> to vector<4x24xf32>
    %52 = vector.shape_cast %51 : vector<4x24xf32> to vector<4x24x1xf32>
    %53 = vector.broadcast %52 : vector<4x24x1xf32> to vector<4x24x24xf32>
    %54 = arith.subf %50, %53 : vector<4x24x24xf32>
    %55 = math.exp %54 : vector<4x24x24xf32>
    %cst_11 = arith.constant dense<0.000000e+00> : vector<4x24xf32>
    %56 = vector.multi_reduction <add>, %55, %cst_11 [2] : vector<4x24x24xf32> to vector<4x24xf32>
    %57 = vector.shape_cast %56 : vector<4x24xf32> to vector<4x24x1xf32>
    %58 = tpu.reciprocal %57 {approx = true} : vector<4x24x1xf32> -> vector<4x24x1xf32>
    %59 = vector.broadcast %58 : vector<4x24x1xf32> to vector<4x24x24xf32>
    %60 = arith.mulf %55, %59 : vector<4x24x24xf32>
    %61 = arith.truncf %60 : vector<4x24x24xf32> to vector<4x24x24xbf16>
    "tpu.trace_start"() <{level = 10 : i32, message = "bqk,bkd->bqd"}> : () -> ()
    %cst_12 = arith.constant dense<0.000000e+00> : vector<4x24x8xf32>
    %62 = tpu.matmul %61, %41, %cst_12 {dimension_numbers = #tpu.dot_dimension_numbers<[2], [1], [1], [2], [0, 0, 0, 1, 1, 2], [0], [0]>} : vector<4x24x24xbf16>, vector<4x24x8xbf16>, vector<4x24x8xf32> -> vector<4x24x8xf32>
    "tpu.trace_stop"() : () -> ()
    %63 = vector.extract_strided_slice %62 {offsets = [0, 0, 0], sizes = [1, 24, 8], strides = [1, 1, 1]} : vector<4x24x8xf32> to vector<1x24x8xf32>
    %64 = vector.shape_cast %63 : vector<1x24x8xf32> to vector<24x8xf32>
    %65 = vector.extract_strided_slice %62 {offsets = [1, 0, 0], sizes = [1, 24, 8], strides = [1, 1, 1]} : vector<4x24x8xf32> to vector<1x24x8xf32>
    %66 = vector.shape_cast %65 : vector<1x24x8xf32> to vector<24x8xf32>
    %67 = vector.extract_strided_slice %62 {offsets = [2, 0, 0], sizes = [1, 24, 8], strides = [1, 1, 1]} : vector<4x24x8xf32> to vector<1x24x8xf32>
    %68 = vector.shape_cast %67 : vector<1x24x8xf32> to vector<24x8xf32>
    %69 = vector.extract_strided_slice %62 {offsets = [3, 0, 0], sizes = [1, 24, 8], strides = [1, 1, 1]} : vector<4x24x8xf32> to vector<1x24x8xf32>
    %70 = vector.shape_cast %69 : vector<1x24x8xf32> to vector<24x8xf32>
    %71 = tpu.concatenate %64, %66, %68, %70 in 1 : vector<24x8xf32>, vector<24x8xf32>, vector<24x8xf32>, vector<24x8xf32> -> vector<24x32xf32>
    %72 = arith.truncf %71 : vector<24x32xf32> to vector<24x32xbf16>
    %c0_13 = arith.constant 0 : index
    %c0_14 = arith.constant 0 : index
    %c0_15 = arith.constant 0 : index
    %73 = vector.load %arg5[%c0_13, %c0_14, %c0_15] : memref<1x32x32xbf16, #tpu.memory_space<vmem>>, vector<1x32x32xbf16>
    %74 = vector.shape_cast %73 : vector<1x32x32xbf16> to vector<32x32xbf16>
    %cst_16 = arith.constant dense<0.000000e+00> : vector<24x32xf32>
    %75 = tpu.matmul %72, %74, %cst_16 {dimension_numbers = #tpu.dot_dimension_numbers<[1], [0], [0], [1], [0, 0, 1, 1], [], []>} : vector<24x32xbf16>, vector<32x32xbf16>, vector<24x32xf32> -> vector<24x32xf32>
    %c0_17 = arith.constant 0 : index
    %c0_18 = arith.constant 0 : index
    %c0_19 = arith.constant 0 : index
    %76 = vector.load %arg6[%c0_17, %c0_18, %c0_19] : memref<1x1x32xf32, #tpu.memory_space<vmem>>, vector<1x1x32xf32>
    %77 = vector.shape_cast %76 : vector<1x1x32xf32> to vector<1x32xf32>
    %78 = vector.broadcast %77 : vector<1x32xf32> to vector<24x32xf32>
    %79 = arith.addf %75, %78 : vector<24x32xf32>
    %80 = arith.addf %3, %79 : vector<24x32xf32>
    %c0_20 = arith.constant 0 : index
    %c0_21 = arith.constant 0 : index
    %c0_22 = arith.constant 0 : index
    %81 = vector.load %arg7[%c0_20, %c0_21, %c0_22] : memref<1x1x32xf32, #tpu.memory_space<vmem>>, vector<1x1x32xf32>
    %82 = vector.shape_cast %81 : vector<1x1x32xf32> to vector<1x32xf32>
    %c0_23 = arith.constant 0 : index
    %c0_24 = arith.constant 0 : index
    %c0_25 = arith.constant 0 : index
    %83 = vector.load %arg8[%c0_23, %c0_24, %c0_25] : memref<1x1x32xf32, #tpu.memory_space<vmem>>, vector<1x1x32xf32>
    %84 = vector.shape_cast %83 : vector<1x1x32xf32> to vector<1x32xf32>
    %cst_26 = arith.constant dense<0.000000e+00> : vector<24xf32>
    %85 = vector.multi_reduction <add>, %80, %cst_26 [1] : vector<24x32xf32> to vector<24xf32>
    %86 = vector.shape_cast %85 : vector<24xf32> to vector<24x1xf32>
    %cst_27 = arith.constant 3.200000e+01 : f32
    %87 = vector.broadcast %cst_27 : f32 to vector<24x1xf32>
    %88 = arith.divf %86, %87 : vector<24x1xf32>
    %89 = vector.broadcast %88 : vector<24x1xf32> to vector<24x32xf32>
    %90 = arith.subf %80, %89 : vector<24x32xf32>
    %91 = arith.mulf %90, %90 : vector<24x32xf32>
    %cst_28 = arith.constant dense<0.000000e+00> : vector<24xf32>
    %92 = vector.multi_reduction <add>, %91, %cst_28 [1] : vector<24x32xf32> to vector<24xf32>
    %93 = vector.shape_cast %92 : vector<24xf32> to vector<24x1xf32>
    %cst_29 = arith.constant 3.200000e+01 : f32
    %94 = vector.broadcast %cst_29 : f32 to vector<24x1xf32>
    %95 = arith.divf %93, %94 : vector<24x1xf32>
    %96 = vector.broadcast %88 : vector<24x1xf32> to vector<24x32xf32>
    %97 = arith.subf %80, %96 : vector<24x32xf32>
    %cst_30 = arith.constant 9.99999974E-6 : f32
    %98 = vector.broadcast %cst_30 : f32 to vector<24x1xf32>
    %99 = arith.addf %95, %98 : vector<24x1xf32>
    %100 = math.rsqrt %99 : vector<24x1xf32>
    %101 = vector.broadcast %100 : vector<24x1xf32> to vector<24x32xf32>
    %102 = arith.mulf %97, %101 : vector<24x32xf32>
    %103 = vector.broadcast %82 : vector<1x32xf32> to vector<24x32xf32>
    %104 = arith.mulf %102, %103 : vector<24x32xf32>
    %105 = vector.broadcast %84 : vector<1x32xf32> to vector<24x32xf32>
    %106 = arith.addf %104, %105 : vector<24x32xf32>
    %107 = arith.truncf %106 : vector<24x32xf32> to vector<24x32xbf16>
    %c0_31 = arith.constant 0 : index
    %c0_32 = arith.constant 0 : index
    %c0_33 = arith.constant 0 : index
    %108 = vector.load %arg9[%c0_31, %c0_32, %c0_33] : memref<1x32x64xbf16, #tpu.memory_space<vmem>>, vector<1x32x64xbf16>
    %109 = vector.shape_cast %108 : vector<1x32x64xbf16> to vector<32x64xbf16>
    %cst_34 = arith.constant dense<0.000000e+00> : vector<24x64xf32>
    %110 = tpu.matmul %107, %109, %cst_34 {dimension_numbers = #tpu.dot_dimension_numbers<[1], [0], [0], [1], [0, 0, 1, 1], [], []>} : vector<24x32xbf16>, vector<32x64xbf16>, vector<24x64xf32> -> vector<24x64xf32>
    %c0_35 = arith.constant 0 : index
    %c0_36 = arith.constant 0 : index
    %c0_37 = arith.constant 0 : index
    %111 = vector.load %arg10[%c0_35, %c0_36, %c0_37] : memref<1x1x64xf32, #tpu.memory_space<vmem>>, vector<1x1x64xf32>
    %112 = vector.shape_cast %111 : vector<1x1x64xf32> to vector<1x64xf32>
    %113 = vector.broadcast %112 : vector<1x64xf32> to vector<24x64xf32>
    %114 = arith.addf %110, %113 : vector<24x64xf32>
    %cst_38 = arith.constant 5.000000e-01 : f32
    %115 = vector.broadcast %cst_38 : f32 to vector<24x64xf32>
    %116 = arith.mulf %115, %114 : vector<24x64xf32>
    %cst_39 = arith.constant 0.707106769 : f32
    %117 = vector.broadcast %cst_39 : f32 to vector<24x64xf32>
    %118 = arith.mulf %114, %117 : vector<24x64xf32>
    %119 = math.erf %118 : vector<24x64xf32>
    %cst_40 = arith.constant 1.000000e+00 : f32
    %120 = vector.broadcast %cst_40 : f32 to vector<24x64xf32>
    %121 = arith.addf %120, %119 : vector<24x64xf32>
    %122 = arith.mulf %116, %121 : vector<24x64xf32>
    %123 = arith.truncf %122 : vector<24x64xf32> to vector<24x64xbf16>
    %c0_41 = arith.constant 0 : index
    %c0_42 = arith.constant 0 : index
    %c0_43 = arith.constant 0 : index
    %124 = vector.load %arg11[%c0_41, %c0_42, %c0_43] : memref<1x64x32xbf16, #tpu.memory_space<vmem>>, vector<1x64x32xbf16>
    %125 = vector.shape_cast %124 : vector<1x64x32xbf16> to vector<64x32xbf16>
    %cst_44 = arith.constant dense<0.000000e+00> : vector<24x32xf32>
    %126 = tpu.matmul %123, %125, %cst_44 {dimension_numbers = #tpu.dot_dimension_numbers<[1], [0], [0], [1], [0, 0, 1, 1], [], []>} : vector<24x64xbf16>, vector<64x32xbf16>, vector<24x32xf32> -> vector<24x32xf32>
    %c0_45 = arith.constant 0 : index
    %c0_46 = arith.constant 0 : index
    %c0_47 = arith.constant 0 : index
    %127 = vector.load %arg12[%c0_45, %c0_46, %c0_47] : memref<1x1x32xf32, #tpu.memory_space<vmem>>, vector<1x1x32xf32>
    %128 = vector.shape_cast %127 : vector<1x1x32xf32> to vector<1x32xf32>
    %129 = vector.broadcast %128 : vector<1x32xf32> to vector<24x32xf32>
    %130 = arith.addf %126, %129 : vector<24x32xf32>
    %131 = arith.addf %106, %130 : vector<24x32xf32>
    %c0_48 = arith.constant 0 : index
    %c0_49 = arith.constant 0 : index
    %c0_50 = arith.constant 0 : index
    %132 = vector.load %arg13[%c0_48, %c0_49, %c0_50] : memref<1x1x32xf32, #tpu.memory_space<vmem>>, vector<1x1x32xf32>
    %133 = vector.shape_cast %132 : vector<1x1x32xf32> to vector<1x32xf32>
    %c0_51 = arith.constant 0 : index
    %c0_52 = arith.constant 0 : index
    %c0_53 = arith.constant 0 : index
    %134 = vector.load %arg14[%c0_51, %c0_52, %c0_53] : memref<1x1x32xf32, #tpu.memory_space<vmem>>, vector<1x1x32xf32>
    %135 = vector.shape_cast %134 : vector<1x1x32xf32> to vector<1x32xf32>
    %cst_54 = arith.constant dense<0.000000e+00> : vector<24xf32>
    %136 = vector.multi_reduction <add>, %131, %cst_54 [1] : vector<24x32xf32> to vector<24xf32>
    %137 = vector.shape_cast %136 : vector<24xf32> to vector<24x1xf32>
    %cst_55 = arith.constant 3.200000e+01 : f32
    %138 = vector.broadcast %cst_55 : f32 to vector<24x1xf32>
    %139 = arith.divf %137, %138 : vector<24x1xf32>
    %140 = vector.broadcast %139 : vector<24x1xf32> to vector<24x32xf32>
    %141 = arith.subf %131, %140 : vector<24x32xf32>
    %142 = arith.mulf %141, %141 : vector<24x32xf32>
    %cst_56 = arith.constant dense<0.000000e+00> : vector<24xf32>
    %143 = vector.multi_reduction <add>, %142, %cst_56 [1] : vector<24x32xf32> to vector<24xf32>
    %144 = vector.shape_cast %143 : vector<24xf32> to vector<24x1xf32>
    %cst_57 = arith.constant 3.200000e+01 : f32
    %145 = vector.broadcast %cst_57 : f32 to vector<24x1xf32>
    %146 = arith.divf %144, %145 : vector<24x1xf32>
    %147 = vector.broadcast %139 : vector<24x1xf32> to vector<24x32xf32>
    %148 = arith.subf %131, %147 : vector<24x32xf32>
    %cst_58 = arith.constant 9.99999974E-6 : f32
    %149 = vector.broadcast %cst_58 : f32 to vector<24x1xf32>
    %150 = arith.addf %146, %149 : vector<24x1xf32>
    %151 = math.rsqrt %150 : vector<24x1xf32>
    %152 = vector.broadcast %151 : vector<24x1xf32> to vector<24x32xf32>
    %153 = arith.mulf %148, %152 : vector<24x32xf32>
    %154 = vector.broadcast %133 : vector<1x32xf32> to vector<24x32xf32>
    %155 = arith.mulf %153, %154 : vector<24x32xf32>
    %156 = vector.broadcast %135 : vector<1x32xf32> to vector<24x32xf32>
    %157 = arith.addf %155, %156 : vector<24x32xf32>
    %158 = arith.cmpf one, %157, %157 : vector<24x32xf32>
    %cst_59 = arith.constant 0.000000e+00 : f32
    %159 = vector.broadcast %cst_59 : f32 to vector<24x32xf32>
    %160 = arith.select %158, %159, %157 : vector<24x32xi1>, vector<24x32xf32>
    %c0_60 = arith.constant 0 : index
    %c0_61 = arith.constant 0 : index
    %161 = vector.load %arg15[%c0_60, %c0_61] : memref<24x32xf32, #tpu.memory_space<vmem>>, vector<24x32xf32>
    tpu.vector_store %arg15[%c0_60, %c0_61], %160 {strides = array<i32>} : memref<24x32xf32, #tpu.memory_space<vmem>>, vector<24x32xf32>,
    return
  }
  func.func @transform_0(%arg0: i32, %arg1: i32) -> (i32, i32) {
    %c0_i32 = arith.constant 0 : i32
    %c0_i32_0 = arith.constant 0 : i32
    return %arg0, %c0_i32 : i32, i32
  }
  func.func @transform_1(%arg0: i32, %arg1: i32) -> (i32, i32, i32) {
    %c0_i32 = arith.constant 0 : i32
    %c0_i32_0 = arith.constant 0 : i32
    %c0_i32_1 = arith.constant 0 : i32
    return %arg1, %c0_i32, %c0_i32_0 : i32, i32, i32
  }
  func.func @transform_2(%arg0: i32, %arg1: i32) -> (i32, i32, i32) {
    %c0_i32 = arith.constant 0 : i32
    %c0_i32_0 = arith.constant 0 : i32
    %c0_i32_1 = arith.constant 0 : i32
    return %arg1, %c0_i32, %c0_i32_0 : i32, i32, i32
  }
  func.func @transform_3(%arg0: i32, %arg1: i32) -> (i32, i32, i32) {
    %c0_i32 = arith.constant 0 : i32
    %c0_i32_0 = arith.constant 0 : i32
    %c0_i32_1 = arith.constant 0 : i32
    return %arg1, %c0_i32, %c0_i32_0 : i32, i32, i32
  }
  func.func @transform_4(%arg0: i32, %arg1: i32) -> (i32, i32, i32) {
    %c0_i32 = arith.constant 0 : i32
    %c0_i32_0 = arith.constant 0 : i32
    %c0_i32_1 = arith.constant 0 : i32
    return %arg1, %c0_i32, %c0_i32_0 : i32, i32, i32
  }
  func.func @transform_5(%arg0: i32, %arg1: i32) -> (i32, i32, i32) {
    %c0_i32 = arith.constant 0 : i32
    %c0_i32_0 = arith.constant 0 : i32
    %c0_i32_1 = arith.constant 0 : i32
    return %arg1, %c0_i32, %c0_i32_0 : i32, i32, i32
  }
  func.func @transform_6(%arg0: i32, %arg1: i32) -> (i32, i32, i32) {
    %c0_i32 = arith.constant 0 : i32
    %c0_i32_0 = arith.constant 0 : i32
    %c0_i32_1 = arith.constant 0 : i32
    return %arg1, %c0_i32, %c0_i32_0 : i32, i32, i32
  }
  func.func @transform_7(%arg0: i32, %arg1: i32) -> (i32, i32, i32) {
    %c0_i32 = arith.constant 0 : i32
    %c0_i32_0 = arith.constant 0 : i32
    %c0_i32_1 = arith.constant 0 : i32
    return %arg1, %c0_i32, %c0_i32_0 : i32, i32, i32
  }
  func.func @transform_8(%arg0: i32, %arg1: i32) -> (i32, i32, i32) {
    %c0_i32 = arith.constant 0 : i32
    %c0_i32_0 = arith.constant 0 : i32
    %c0_i32_1 = arith.constant 0 : i32
    return %arg1, %c0_i32, %c0_i32_0 : i32, i32, i32
  }
  func.func @transform_9(%arg0: i32, %arg1: i32) -> (i32, i32, i32) {
    %c0_i32 = arith.constant 0 : i32
    %c0_i32_0 = arith.constant 0 : i32
    %c0_i32_1 = arith.constant 0 : i32
    return %arg1, %c0_i32, %c0_i32_0 : i32, i32, i32
  }
  func.func @transform_10(%arg0: i32, %arg1: i32) -> (i32, i32, i32) {
    %c0_i32 = arith.constant 0 : i32
    %c0_i32_0 = arith.constant 0 : i32
    %c0_i32_1 = arith.constant 0 : i32
    return %arg1, %c0_i32, %c0_i32_0 : i32, i32, i32
  }
  func.func @transform_11(%arg0: i32, %arg1: i32) -> (i32, i32, i32) {
    %c0_i32 = arith.constant 0 : i32
    %c0_i32_0 = arith.constant 0 : i32
    %c0_i32_1 = arith.constant 0 : i32
    return %arg1, %c0_i32, %c0_i32_0 : i32, i32, i32
  }
  func.func @transform_12(%arg0: i32, %arg1: i32) -> (i32, i32, i32) {
    %c0_i32 = arith.constant 0 : i32
    %c0_i32_0 = arith.constant 0 : i32
    %c0_i32_1 = arith.constant 0 : i32
    return %arg1, %c0_i32, %c0_i32_0 : i32, i32, i32
  }
  func.func @transform_13(%arg0: i32, %arg1: i32) -> (i32, i32) {
    %c0_i32 = arith.constant 0 : i32
    %c0_i32_0 = arith.constant 0 : i32
    return %arg0, %c0_i32 : i32, i32
  }
}

</mosaic_0001>

<bundles_post_ra>
// kernel: transformer_forward.1
= control target key start
LH: loop header
LB: loop body
LE: loop exit
PB: predicated region body
PF: predicated region fallthrough
CT: control target
= control target key end

     0   :  { %s2598_s25 = smov 0   ;;  %s2600_s26 = smov 0   ;;  %s3031_s0 = inlined_call_operand.vmem [shape: f32[48,32], index: 0, kind: input, shape index: {}]   ;;  %s3032_s1 = inlined_call_operand.vmem [shape: bf16[2,32,96], index: 1, kind: input, shape index: {}]   ;;  %s3033_s2 = inlined_call_operand.vmem [shape: f32[2,1,96], index: 2, kind: input, shape index: {}]   ;;  %s3034_s3 = inlined_call_operand.vmem [shape: bf16[2,32,32], index: 3, kind: input, shape index: {}]   ;;  %s3035_s4 = inlined_call_operand.vmem [shape: f32[2,1,32], index: 4, kind: input, shape index: {}]   ;;  %s3036_s5 = inlined_call_operand.vmem [shape: f32[2,1,32], index: 5, kind: input, shape index: {}]   ;;  %s3037_s6 = inlined_call_operand.vmem [shape: f32[2,1,32], index: 6, kind: input, shape index: {}]   ;;  %s3038_s7 = inlined_call_operand.vmem [shape: bf16[2,32,64], index: 7, kind: input, shape index: {}]   ;;  %s3039_s8 = inlined_call_operand.vmem [shape: f32[2,1,64], index: 8, kind: input, shape index: {}]   ;;  %s3040_s9 = inlined_call_operand.vmem [shape: bf16[2,64,32], index: 9, kind: input, shape index: {}]   ;;  %s3041_s10 = inlined_call_operand.vmem [shape: f32[2,1,32], index: 10, kind: input, shape index: {}]   ;;  %s3042_s11 = inlined_call_operand.vmem [shape: f32[2,1,32], index: 11, kind: input, shape index: {}]   ;;  %s3043_s12 = inlined_call_operand.vmem [shape: f32[2,1,32], index: 12, kind: input, shape index: {}]   ;;  %s3044_s13 = inlined_call_operand.vmem [shape: f32[48,32], index: 13, kind: output, shape index: {}]  }
   0x1   :  { %3049 = sst [smem:[#allocation8_spill]] %s3031_s0  ;;  %s2602_s27 = smov 0  }
   0x2   :  { %3050 = sst [smem:[#allocation9_spill]] %s3032_s1  ;;  %s2604_s28 = smov 0  }
   0x3   :  { %3051 = sst [smem:[#allocation10_spill]] %s3034_s3  ;;  %s2606_s29 = smov 0  }
   0x4   :  { %3052 = sst [smem:[#allocation11_spill]] %s3038_s7 }
   0x5   :  { %3053 = sst [smem:[#allocation12_spill]] %s3039_s8 }
   0x6   :  { %3054 = sst [smem:[#allocation13_spill]] %s3043_s12 }
   0x7   :  { %3055 = sst [smem:[#allocation14_spill]] %s3044_s13 }
   0x8 LB: > { %3056 = sst [smem:[#allocation2_spill]] %s2502_s25  ;;  %s32_s30 = sadd.s32 1, %s2510_s27  ;;  %s2518_s29 = sphi %s2606_s29, %s23_s29   ;;  %s2514_s28 = sphi %s2604_s28, %s3081_s28   ;;  %s2510_s27 = sphi %s2602_s27, %s3080_s27   ;;  %s2506_s26 = sphi %s2600_s26, %s3079_s26   ;;  %s2502_s25 = sphi %s2598_s25, %s3078_s25  }
   0x9   : > { %3057 = sst [smem:[#allocation3_spill]] %s2510_s27  ;;  %s35_s14 = sadd.s32 1, %s2514_s28 }
   0xa   : > { %3058 = sst [smem:[#allocation4_spill]] %s2514_s28  ;;  %p33_p0 = scmp.ge.s32.totalorder %s32_s30, 2 }
   0xb   : > { %3059 = sst [smem:[#allocation5_spill]] %s2518_s29  ;;  %p2104_p1 = scmp.ge.s32.totalorder %s2518_s29, 1 }
   0xc   : > { %p504_p2 = scmp.lt.s32.totalorder %s2518_s29, 5  ;;  %s3083_s30 = smov (%p33_p0, %s32_s30), 0 }
   0xd   : > { %3060 = sst [smem:[#allocation6_spill]] %s3083_s30  ;;  %s3085_s14 = smov (!%p33_p0, %s35_s14), %s2514_s28 }
   0xe   : > { %p505_p3 = pnand %p2104_p1, %p504_p2  ;;  %p37_p4 = scmp.ge.s32.totalorder %s3085_s14, 2 }
   0xf   : > { %s592_s15 = smul.u32 (!%p505_p3), 3, %s2506_s26  ;;  %p598_p5 = scmp.lt.s32.totalorder (!%p505_p3), %s2502_s25, 1 }
  0x10   : > { %s3087_s14 = smov (%p37_p4, %s3085_s14), 0  ;;  %508 = sbr.rel (%p505_p3) target bundleno = 2758 (0xac6), region = 72 }
  0x11   : > { %3061 = sst [smem:[#allocation7_spill]] %s3087_s14  ;;  %p593_p6 = scmp.lt.s32.totalorder (!%p505_p3), %s592_s15, 5 }
  0x12   : > { %s3062_s1 = sld [smem:[#allocation9_spill]] (!%p505_p3)  ;;  %s3063_s0 = sld [smem:[#allocation8_spill]] (!%p505_p3) }
  0x13   : > { %s3064_s3 = sld [smem:[#allocation10_spill]] (!%p505_p3)  ;;  %s3065_s7 = sld [smem:[#allocation11_spill]] (!%p505_p3) }
  0x14   : > { %s3069_s13 = sld [smem:[#allocation2_spill]] (!%p505_p3) }
  0x17   : > { %s2632_s16 = scalar_select %p598_p5, %s2502_s25, 1 }
  0x18   : > { %s3089_s15 = smov (!%p593_p6, %s592_s15), 5 }
  0x19   : > { %s2160_s17 = sshll.u32 %s2632_s16, 4  ;;  %s2105_s21 = sshll.u32 %s3089_s15, 3 }
  0x1a   : > { %s602_s24 = scalar_lea.vmem %s3062_s1, %s2160_s17  ;;  %s596_s30 = scalar_lea.vmem %s3063_s0, %s2105_s21 }
  0x1b   : > { %s2648_s29 = scalar_lea.vmem %s3064_s3, %s2160_s17  ;;  %s2665_s26 = scalar_lea.vmem %s3065_s7, %s2160_s17 }
  0x1c   : > { %s2163_s3 = sshll.u32 %s2632_s16, 5  ;;  %s635_s20 = scalar_lea.vmem %s3041_s10, %s2632_s16 }
  0x1d   : > { %s2675_s12 = scalar_lea.vmem %s3040_s9, %s2163_s3  ;;  %s638_s1 = scalar_lea.vmem %s3042_s11, %s2632_s16 }
  0x1e   : > { %s3067_s15 = sld [smem:[#allocation13_spill]]  ;;  %s3068_s0 = sld [smem:[#allocation14_spill]] }
  0x1f   : > { %p2115_p7 = scmp.ne.s32.totalorder %s3069_s13, 0 }
  0x20   : > { %v653_v0 = vld [vmem:[%s596_s30] sm:$0xff] (!%p2115_p7)  ;;  %vm656_vm0 = vcmask (!%p2115_p7), 261120   ;;  %v654_v1 = vld [vmem:[%s596_s30 + $0x8] sm:$0xff] (!%p2115_p7)  ;;  %v655_v2 = vld [vmem:[%s596_s30 + $0x10] sm:$0xff] (!%p2115_p7) }
  0x21   : > { %652 = sbr.rel (%p2115_p7) target bundleno = 40 (0x28), region = 76 }
  0x24   : > { %s641_s7 = scalar_lea.vmem %s3067_s15, %s2632_s16  ;;  %s2692_s8 = scalar_lea.vmem %s3068_s0, %s2105_s21 }
  0x25   : > { %657 = vst.msk [vmem:[%s2692_s8] sm:$0xff] (!%p2115_p7), %vm656_vm0, %v653_v0  ;;  %658 = vst.msk [vmem:[%s2692_s8 + $0x8] sm:$0xff] (!%p2115_p7), %vm656_vm0, %v654_v1 }
  0x26   : > { %659 = vst.msk [vmem:[%s2692_s8 + $0x10] sm:$0xff] (!%p2115_p7), %vm656_vm0, %v655_v2 }
  0x28 PF: > { %v2404_v3 = vld [vmem:[%s602_s24] sm:$0xff]   ;;  %v2405_v4 = vld [vmem:[%s602_s24 + $0x8] sm:$0xff]   ;;  %vm688_vm1 = vcmask 261120   ;;  %s3070_s30 = scalar_lea.vmem %s3033_s2, %s2632_s16  ;;  %vm787_vm2 = vcmask 64512   ;;  %s2520_s21 = smov 112   ;;  %v1046_v55 = vlaneseq  ;;  %vm1073_vm4 = vcmask 195584  }
  0x29   : > { %2214 = vmatprep.subr.bf16.mxu0 %v2404_v3  ;;  %v2116_v11 = vld [vmem:[%s3070_s30] ss:$0 sm:$0xff]  ;;  %s2521_s24 = smov 120   ;;  %s2522_s15 = smov 104   ;;  %vm1225_vm7 = vcmask 1043456   ;;  %vm1502_vm8 = vcmask 130048  }
  0x2a   : > { %2215 = vmatpush3.bf16.msra.mxu0 %v2404_v3  ;;  %s2523_s23 = smov 96   ;;  %v1047_v56 = vshrl.u32 %v1046_v55, 7  ;;  %v1051_v58 = vand.u32 127, %v1046_v55  ;;  %s2524_s25 = smov 64   ;;  %vm1786_vm9 = vcmask 523264  }
  0x2b   : > { %2216 = vmatprep.subr.bf16.mxu0 %v2405_v4  ;;  %s2525_s18 = smov 8   ;;  %s2526_s19 = smov 16  }
  0x2c   : > { %v2699_v5 = vld [vmem:[%s2692_s8] sm:$0xff]  ;;  %v2702_v6 = vld [vmem:[%s2692_s8 + $0x8] sm:$0xff]  ;;  %v1049_v57 = vadd.s32 16, %v1047_v56  ;;  %v1048_v59 = vadd.s32 8, %v1047_v56  ;;  %vm1052_vm5 = vcmp.ge.s32.totalorder %v1047_v56, %v1051_v58  ;;  %s2527_s22 = smov 24   ;;  %s3071_s14 = scalar_lea.vmem %s3035_s4, %s2632_s16 }
  0x2d   : > { %v2705_v7 = vld [vmem:[%s2692_s8 + $0x10] sm:$0xff]  ;;  %v663_v8 = vpack.c.bf16 %v2702_v6, %v2699_v5  ;;  %s3072_s28 = scalar_lea.vmem %s3036_s5, %s2632_s16  ;;  %s3073_s3 = scalar_lea.vmem %s3037_s6, %s2632_s16 }
  0x2e   : > { %v664_v9 = vpack.c.bf16 %v2705_v7, %v2705_v7  ;;  %2217 = vmatpush3.bf16.msra.mxu0 %v2405_v4  ;;  %vm1054_vm3 = vcmp.ge.s32.totalorder %v1049_v57, %v1051_v58  ;;  %vm1053_vm6 = vcmp.ge.s32.totalorder %v1048_v59, %v1051_v58 }
  0x2f   : > { %2218 = vmatprep.mubr.msk.bf16.mxu0 %vm688_vm1, %v663_v8 }
  0x31   : > { %2219 = vmatmul.mubr.msk.bf16.vlgmr.msra.gmra.mrb[0].mxu0 %vm688_vm1, %v664_v9 }
 0x104   : > { %v2220_v10 = vpop.f32.mrb[0].mxu0 }
 0x105   : > { %v729_v12 = vpop.f32.mrb[1].mxu0  ;;  %v738_v19 = vadd.f32 %v2220_v10, %v2116_v11 }
 0x106   : > { %v2221_v13 = vpop.f32.mrb[2].mxu0  ;;  %v730_v15 = vadd.f32 %v2116_v11, %v729_v12 }
 0x107   : > { %v732_v14 = vpop.f32.mrb[3].mxu0  ;;  %v2724_v20 = vpack.c.bf16 %v738_v19, %v738_v19 }
 0x108   : > { %v733_v16 = vadd.f32 %v2116_v11, %v732_v14 }
 0x10a   : > { %v2379_v17 = vpack.i.bf16 %v733_v16, %v730_v15  ;;  %v2718_v18 = vpack.c.bf16 %v733_v16, %v730_v15 }
 0x10c   : > { %2380 = vrot.lane.b32.xlu1 %v2379_v17, %s2520_s21  ;;  %2375 = vrot.lane.b32.xlu0 %v2379_v17, %s2521_s24 }
 0x10d   : > { %2226 = vmatprep.mubr.msk.bf16.mxu1 %vm787_vm2, %v2718_v18 }
 0x110   : > { %2385 = vrot.lane.b32.xlu1 %v2379_v17, %s2522_s15  ;;  %750 = vrot.lane.b32.xlu0 %v738_v19, %s2521_s24  ;;  %s3074_s24 = sld [smem:[#allocation12_spill]] }
 0x114   : > { %768 = vrot.lane.b32.xlu1 %v738_v19, %s2522_s15  ;;  %759 = vrot.lane.b32.xlu0 %v738_v19, %s2520_s21 }
 0x116   : > { %s3075_s15 = scalar_lea.vmem %s3074_s24, %s2632_s16 }
 0x118   : > { %783 = vrot.lane.b32.xlu0 %v2718_v18, %s2523_s23 }
 0x11c   : > { %785 = vrot.lane.b32.xlu0 %v2724_v20, %s2523_s23 }
 0x17e   : > { %v2381_v21 = vpop.permute.xlu1 %2380  ;;  %v2376_v22 = vpop.permute.xlu0 %2375 }
 0x17f   : > { %v2383_v23 = vunpack.i.h.bf16 %v2381_v21  ;;  %v2382_v24 = vunpack.i.l.bf16 %v2381_v21  ;;  %v2378_v25 = vunpack.i.h.bf16 %v2376_v22  ;;  %v2377_v26 = vunpack.i.l.bf16 %v2376_v22 }
 0x181   : > { %v2728_v27 = vpack.c.bf16 %v2383_v23, %v2382_v24  ;;  %v2730_v28 = vpack.c.bf16 %v2378_v25, %v2377_v26 }
 0x182   : > { %v2386_v29 = vpop.permute.xlu1 %2385  ;;  %v751_v30 = vpop.permute.xlu0 %750 }
 0x183   : > { %850 = vrot.lane.b32.xlu1 %v2730_v28, %s2523_s23  ;;  %2234 = vmatprep.mubr.msk.bf16.mxu0 %vm787_vm2, %v2730_v28  ;;  %v2388_v31 = vunpack.i.h.bf16 %v2386_v29  ;;  %v2387_v32 = vunpack.i.l.bf16 %v2386_v29  ;;  %v2738_v33 = vpack.c.bf16 %v751_v30, %v751_v30 }
 0x184   : > { %916 = vrot.lane.b32.xlu0 %v2728_v27, %s2523_s23 }
 0x185   : > { %v2744_v36 = vpack.c.bf16 %v2388_v31, %v2387_v32 }
 0x186   : > { %v760_v34 = vpop.permute.xlu0 %759  ;;  %v769_v37 = vpop.permute.xlu1 %768 }
 0x187   : > { %v2740_v35 = vpack.c.bf16 %v760_v34, %v760_v34  ;;  %852 = vrot.lane.b32.xlu1 %v2738_v33, %s2523_s23  ;;  %v2752_v40 = vpack.c.bf16 %v769_v37, %v769_v37 }
 0x189   : > { %918 = vrot.lane.b32.xlu0 %v2740_v35, %s2523_s23 }
 0x18a   : > { %v784_v38 = vpop.permute.xlu0 %783 }
 0x18b   : > { %982 = vrot.lane.b32.xlu1 %v2744_v36, %s2523_s23  ;;  %2314 = vmatprep.subr.msk.bf16.mxu1 %vm787_vm2, %v784_v38  ;;  %v795_v39 = vsel %vm787_vm2, %v784_v38, 0 }
 0x18c   : > { %2223 = vmatpush3.bf16.xpose.msra.mxu1 %v795_v39 }
 0x18e   : > { %v786_v41 = vpop.permute.xlu0 %785 }
 0x18f   : > { %984 = vrot.lane.b32.xlu1 %v2752_v40, %s2523_s23  ;;  %2315 = vmatprep.subr.msk.bf16.mxu1 %vm787_vm2, %v786_v41  ;;  %v798_v42 = vsel %vm787_vm2, %v786_v41, 0 }
 0x194   : > { %2225 = vmatpush3.bf16.xpose.msra.mxu1 %v798_v42 }
 0x19b   : > { %2227 = vmatmul.mubr.msk.bf16.vlgmr.msra.gmra.mrb[0].mxu1 %vm787_vm2, %v2724_v20 }
 0x19c   : > { %2242 = vmatprep.mubr.msk.bf16.mxu1 %vm787_vm2, %v2728_v27 }
 0x1f5   : > { %v851_v43 = vpop.permute.xlu1 %850 }
 0x1f6   : > { %v861_v44 = vsel %vm787_vm2, %v851_v43, 0  ;;  %v917_v45 = vpop.permute.xlu0 %916  ;;  %2316 = vmatprep.subr.msk.bf16.mxu0 %vm787_vm2, %v851_v43 }
 0x1f7   : > { %v927_v46 = vsel %vm787_vm2, %v917_v45, 0  ;;  %2318 = vmatprep.subr.msk.bf16.mxu1 %vm787_vm2, %v917_v45  ;;  %2231 = vmatpush3.bf16.xpose.msra.mxu0 %v861_v44 }
 0x1f8   : > { %2239 = vmatpush3.bf16.xpose.msra.mxu1 %v927_v46 }
 0x1f9   : > { %v853_v47 = vpop.permute.xlu1 %852 }
 0x1fa   : > { %2317 = vmatprep.subr.msk.bf16.mxu0 %vm787_vm2, %v853_v47  ;;  %v864_v49 = vsel %vm787_vm2, %v853_v47, 0 }
 0x1fb   : > { %v919_v48 = vpop.permute.xlu0 %918 }
 0x1fc   : > { %2319 = vmatprep.subr.msk.bf16.mxu1 %vm787_vm2, %v919_v48  ;;  %v930_v50 = vsel %vm787_vm2, %v919_v48, 0 }
 0x1fd   : > { %v983_v51 = vpop.permute.xlu1 %982 }
 0x1fe   : > { %v993_v52 = vsel %vm787_vm2, %v983_v51, 0 }
 0x1ff   : > { %2233 = vmatpush3.bf16.xpose.msra.mxu0 %v864_v49 }
 0x200   : > { %2241 = vmatpush3.bf16.xpose.msra.mxu1 %v930_v50  ;;  %2320 = vmatprep.subr.msk.bf16.mxu0 %vm787_vm2, %v983_v51 }
 0x201   : > { %v985_v53 = vpop.permute.xlu1 %984 }
 0x202   : > { %v996_v54 = vsel %vm787_vm2, %v985_v53, 0 }
 0x206   : > { %2235 = vmatmul.mubr.msk.bf16.vlgmr.msra.gmra.mrb[4].mxu0 %vm787_vm2, %v2738_v33 }
 0x207   : > { %2243 = vmatmul.mubr.msk.bf16.vlgmr.msra.gmra.mrb[4].mxu1 %vm787_vm2, %v2740_v35  ;;  %2247 = vmatpush3.bf16.xpose.msra.mxu0 %v993_v52 }
 0x208   : > { %2250 = vmatprep.mubr.msk.bf16.mxu0 %vm787_vm2, %v2744_v36  ;;  %2321 = vmatprep.subr.msk.bf16.mxu0 %vm787_vm2, %v985_v53 }
 0x20f   : > { %2249 = vmatpush3.bf16.xpose.msra.mxu0 %v996_v54 }
 0x216   : > { %2251 = vmatmul.mubr.msk.bf16.vlgmr.msra.gmra.mrb[8].mxu0 %vm787_vm2, %v2752_v40 }
 0x26e   : > { %v2228_v60 = vpop.f32.mrb[0].mxu1 }
 0x26f   : > { %v2783_v61 = vsel %vm1054_vm3, %v2228_v60, -1e+30  ;;  %v834_v62 = vpop.f32.mrb[1].mxu1 }
 0x270   : > { %v2229_v63 = vpop.f32.mrb[2].mxu1  ;;  %v1080_v0 = vsel %vm1073_vm4, %v2783_v61, -inf  ;;  %v2788_v1 = vsel %vm1052_vm5, %v834_v62, -1e+30 }
 0x271   : > { %1081 = vmax.xlane.f32.xlu0 %v1080_v0  ;;  %v837_v2 = vpop.f32.mrb[3].mxu1  ;;  %v1074_v8 = vsel %vm1073_vm4, %v2788_v1, -inf }
 0x272   : > { %v1062_v3 = vsel %vm1053_vm6, %v837_v2, -1e+30 }
 0x273   : > { %v1077_v4 = vsel %vm1073_vm4, %v1062_v3, -inf }
 0x274   : > { %1078 = vmax.xlane.f32.xlu1 %v1077_v4 }
 0x275   : > { %1075 = vmax.xlane.f32.xlu0 %v1074_v8 }
 0x2d9   : > { %v2236_v9 = vpop.f32.mrb[4].mxu0 }
 0x2da   : > { %v2795_v10 = vsel %vm1054_vm3, %v2236_v9, -1e+30  ;;  %v2244_v11 = vpop.f32.mrb[4].mxu1  ;;  %v900_v12 = vpop.f32.mrb[5].mxu0 }
 0x2db   : > { %v2798_v13 = vsel %vm1054_vm3, %v2244_v11, -1e+30  ;;  %v966_v14 = vpop.f32.mrb[5].mxu1  ;;  %v2237_v15 = vpop.f32.mrb[6].mxu0  ;;  %v1089_v19 = vsel %vm1073_vm4, %v2795_v10, -inf }
 0x2dc   : > { %v2245_v16 = vpop.f32.mrb[6].mxu1  ;;  %v903_v17 = vpop.f32.mrb[7].mxu0  ;;  %v1098_v21 = vsel %vm1073_vm4, %v2798_v13, -inf  ;;  %v2805_v22 = vsel %vm1052_vm5, %v900_v12, -1e+30  ;;  %1090 = vmax.xlane.f32.xlu0 %v1089_v19 }
 0x2dd   : > { %v2808_v23 = vsel %vm1052_vm5, %v966_v14, -1e+30  ;;  %1099 = vmax.xlane.f32.xlu1 %v1098_v21  ;;  %v969_v24 = vpop.f32.mrb[7].mxu1  ;;  %v1083_v25 = vsel %vm1073_vm4, %v2805_v22, -inf  ;;  %v2815_v29 = vsel %vm1053_vm6, %v903_v17, -1e+30 }
 0x2de   : > { %v1092_v26 = vsel %vm1073_vm4, %v2808_v23, -inf  ;;  %v2818_v30 = vsel %vm1053_vm6, %v969_v24, -1e+30  ;;  %v1086_v31 = vsel %vm1073_vm4, %v2815_v29, -inf }
 0x2df   : > { %v1095_v32 = vsel %vm1073_vm4, %v2818_v30, -inf }
 0x2e0   : > { %1084 = vmax.xlane.f32.xlu0 %v1083_v25 }
 0x2e1   : > { %1093 = vmax.xlane.f32.xlu1 %v1092_v26 }
 0x2e4   : > { %1096 = vmax.xlane.f32.xlu0 %v1095_v32 }
 0x2e5   : > { %1087 = vmax.xlane.f32.xlu1 %v1086_v31 }
 0x2e9   : > { %v2252_v34 = vpop.f32.mrb[8].mxu0 }
 0x2ea   : > { %v1032_v37 = vpop.f32.mrb[9].mxu0  ;;  %v2830_v43 = vsel %vm1054_vm3, %v2252_v34, -1e+30 }
 0x2eb   : > { %v2825_v38 = vsel %vm1052_vm5, %v1032_v37, -1e+30  ;;  %v2253_v39 = vpop.f32.mrb[10].mxu0  ;;  %v1107_v44 = vsel %vm1073_vm4, %v2830_v43, -inf }
 0x2ec   : > { %v1035_v41 = vpop.f32.mrb[11].mxu0  ;;  %v1101_v42 = vsel %vm1073_vm4, %v2825_v38, -inf }
 0x2ed   : > { %1102 = vmax.xlane.f32.xlu0 %v1101_v42  ;;  %v2841_v47 = vsel %vm1053_vm6, %v1035_v41, -1e+30 }
 0x2ee   : > { %v1104_v49 = vsel %vm1073_vm4, %v2841_v47, -inf }
 0x2f1   : > { %1108 = vmax.xlane.f32.xlu0 %v1107_v44 }
 0x2f6   : > { %1214 = vrot.lane.b32.xlu1 %v2718_v18, %s2524_s25 }
 0x301   : > { %v1079_v45 = vpop.xlane.xlu1 %1078 }
 0x302   : > { %v1111_v46 = vsub.f32 %v1062_v3, %v1079_v45 }
 0x304   : > { %v1124_v48 = vmul.f32 1.442695, %v1111_v46 }
 0x306   : > { %2414 = vpow2.f32 %v1124_v48 }
 0x307   : > { %1277 = vrot.lane.b32.xlu0 %v2730_v28, %s2524_s25 }
 0x30b   : > { %1339 = vrot.lane.b32.xlu0 %v2728_v27, %s2524_s25  ;;  %v1082_v27 = vpop.xlane.xlu0 %1081 }
 0x30c   : > { %v1112_v28 = vsub.f32 %v2783_v61, %v1082_v27 }
 0x30e   : > { %v1126_v52 = vmul.f32 1.442695, %v1112_v28 }
 0x30f   : > { %v1076_v51 = vpop.xlane.xlu0 %1075 }
 0x310   : > { %v2845_v50 = vpop.eup %2414  ;;  %v1110_v53 = vsub.f32 %v2788_v1, %v1076_v51  ;;  %2416 = vpow2.f32 %v1126_v52 }
 0x311   : > { %v1149_v18 = vsel %vm1073_vm4, %v2845_v50, 0.0 }
 0x312   : > { %v1122_v54 = vmul.f32 1.442695, %v1110_v53 }
 0x314   : > { %2418 = vpow2.f32 %v1122_v54 }
 0x31a   : > { %1105 = vmax.xlane.f32.xlu1 %v1104_v49  ;;  %v2857_v55 = vpop.eup %2416 }
 0x31e   : > { %v2861_v56 = vpop.eup %2418 }
 0x32a   : > { %1150 = vadd.xlane.f32.xlu0 %v1149_v18 }
 0x32b   : > { %1216 = vrot.lane.b32.xlu1 %v2724_v20, %s2524_s25  ;;  %v1152_v20 = vsel %vm1073_vm4, %v2857_v55, 0.0 }
 0x32f   : > { %1279 = vrot.lane.b32.xlu1 %v2738_v33, %s2524_s25  ;;  %v1146_v33 = vsel %vm1073_vm4, %v2861_v56, 0.0 }
 0x333   : > { %1401 = vrot.lane.b32.xlu1 %v2744_v36, %s2524_s25 }
 0x357   : > { %1153 = vadd.xlane.f32.xlu1 %v1152_v20 }
 0x35b   : > { %1147 = vadd.xlane.f32.xlu1 %v1146_v33 }
 0x369   : > { %v1091_v36 = vpop.xlane.xlu0 %1090 }
 0x36a   : > { %v1100_v57 = vpop.xlane.xlu1 %1099  ;;  %v1115_v58 = vsub.f32 %v2795_v10, %v1091_v36 }
 0x36b   : > { %v1118_v59 = vsub.f32 %v2798_v13, %v1100_v57 }
 0x36c   : > { %v1132_v60 = vmul.f32 1.442695, %v1115_v58 }
 0x36d   : > { %v1138_v61 = vmul.f32 1.442695, %v1118_v59  ;;  %v1085_v62 = vpop.xlane.xlu0 %1084 }
 0x36e   : > { %v1094_v63 = vpop.xlane.xlu1 %1093  ;;  %2420 = vpow2.f32 %v1132_v60  ;;  %v1113_v0 = vsub.f32 %v2805_v22, %v1085_v62 }
 0x36f   : > { %v1116_v1 = vsub.f32 %v2808_v23, %v1094_v63  ;;  %2422 = vpow2.f32 %v1138_v61 }
 0x370   : > { %v1128_v2 = vmul.f32 1.442695, %v1113_v0 }
 0x371   : > { %v1134_v3 = vmul.f32 1.442695, %v1116_v1  ;;  %v1097_v8 = vpop.xlane.xlu0 %1096 }
 0x372   : > { %v1088_v4 = vpop.xlane.xlu1 %1087  ;;  %2424 = vpow2.f32 %v1128_v2  ;;  %v1117_v10 = vsub.f32 %v2818_v30, %v1097_v8 }
 0x373   : > { %v1114_v9 = vsub.f32 %v2815_v29, %v1088_v4  ;;  %2426 = vpow2.f32 %v1134_v3 }
 0x374   : > { %v1136_v12 = vmul.f32 1.442695, %v1117_v10 }
 0x375   : > { %v1130_v11 = vmul.f32 1.442695, %v1114_v9 }
 0x376   : > { %v1215_v13 = vpop.permute.xlu1 %1214 }
 0x377   : > { %2428 = vpow2.f32 %v1130_v11  ;;  %2254 = vmatprep.subr.bf16.mxu1 %v1215_v13 }
 0x378   : > { %2430 = vpow2.f32 %v1136_v12  ;;  %2255 = vmatpush3.bf16.msra.mxu1 %v1215_v13  ;;  %v2871_v14 = vpop.eup %2420 }
 0x379   : > { %v2873_v15 = vpop.eup %2422  ;;  %v1161_v16 = vsel %vm1073_vm4, %v2871_v14, 0.0 }
 0x37a   : > { %v1103_v17 = vpop.xlane.xlu0 %1102  ;;  %v1170_v19 = vsel %vm1073_vm4, %v2873_v15, 0.0  ;;  %1162 = vadd.xlane.f32.xlu0 %v1161_v16 }
 0x37b   : > { %1171 = vadd.xlane.f32.xlu1 %v1170_v19  ;;  %v1119_v22 = vsub.f32 %v2825_v38, %v1103_v17 }
 0x37c   : > { %v2879_v21 = vpop.eup %2424 }
 0x37d   : > { %v2882_v23 = vpop.eup %2426  ;;  %v1155_v24 = vsel %vm1073_vm4, %v2879_v21, 0.0  ;;  %v1140_v31 = vmul.f32 1.442695, %v1119_v22 }
 0x37e   : > { %v1109_v25 = vpop.xlane.xlu0 %1108  ;;  %v1164_v26 = vsel %vm1073_vm4, %v2882_v23, 0.0  ;;  %1156 = vadd.xlane.f32.xlu0 %v1155_v24 }
 0x37f   : > { %v1121_v29 = vsub.f32 %v2830_v43, %v1109_v25  ;;  %1165 = vadd.xlane.f32.xlu1 %v1164_v26 }
 0x381   : > { %v2889_v30 = vpop.eup %2428  ;;  %v1144_v32 = vmul.f32 1.442695, %v1121_v29 }
 0x382   : > { %v2891_v34 = vpop.eup %2430  ;;  %v1158_v37 = vsel %vm1073_vm4, %v2889_v30, 0.0  ;;  %v1278_v38 = vpop.permute.xlu0 %1277 }
 0x383   : > { %2432 = vpow2.f32 %v1144_v32  ;;  %v1167_v39 = vsel %vm1073_vm4, %v2891_v34, 0.0  ;;  %2262 = vmatprep.subr.bf16.mxu0 %v1278_v38  ;;  %1159 = vadd.xlane.f32.xlu1 %v1158_v37 }
 0x384   : > { %1168 = vadd.xlane.f32.xlu0 %v1167_v39  ;;  %2434 = vpow2.f32 %v1140_v31  ;;  %2263 = vmatpush3.bf16.msra.mxu0 %v1278_v38 }
 0x386   : > { %v1340_v27 = vpop.permute.xlu0 %1339 }
 0x38d   : > { %v2897_v41 = vpop.eup %2432 }
 0x38e   : > { %v1179_v42 = vsel %vm1073_vm4, %v2897_v41, 0.0  ;;  %v2901_v43 = vpop.eup %2434 }
 0x38f   : > { %1180 = vadd.xlane.f32.xlu0 %v1179_v42  ;;  %v1173_v44 = vsel %vm1073_vm4, %v2901_v43, 0.0 }
 0x393   : > { %1174 = vadd.xlane.f32.xlu0 %v1173_v44 }
 0x3a7   : > { %v1106_v45 = vpop.xlane.xlu1 %1105 }
 0x3a8   : > { %v1120_v46 = vsub.f32 %v2841_v47, %v1106_v45 }
 0x3a9   : > { %1341 = vrot.lane.b32.xlu0 %v2740_v35, %s2524_s25 }
 0x3aa   : > { %v1142_v48 = vmul.f32 1.442695, %v1120_v46 }
 0x3ab   : > { %v1217_v49 = vpop.permute.xlu1 %1216 }
 0x3ac   : > { %2436 = vpow2.f32 %v1142_v48  ;;  %v1227_v18 = vsel %vm1225_vm7, %v1217_v49, 0  ;;  %2322 = vmatprep.subr.msk.bf16.mxu1 %vm1225_vm7, %v1217_v49 }
 0x3ad   : > { %2257 = vmatpush3.bf16.msra.mxu1 %v1227_v18 }
 0x3ae   : > { %2270 = vmatprep.subr.bf16.mxu1 %v1340_v27 }
 0x3af   : > { %v1280_v28 = vpop.permute.xlu1 %1279 }
 0x3b0   : > { %v1289_v51 = vsel %vm1225_vm7, %v1280_v28, 0  ;;  %2323 = vmatprep.subr.msk.bf16.mxu0 %vm1225_vm7, %v1280_v28 }
 0x3b1   : > { %2265 = vmatpush3.bf16.msra.mxu0 %v1289_v51 }
 0x3b3   : > { %v1402_v47 = vpop.permute.xlu1 %1401 }
 0x3b4   : > { %2278 = vmatprep.subr.bf16.mxu0 %v1402_v47 }
 0x3b6   : > { %v2912_v35 = vpop.eup %2436 }
 0x3b7   : > { %v1176_v52 = vsel %vm1073_vm4, %v2912_v35, 0.0  ;;  %v1151_v53 = vpop.xlane.xlu0 %1150 }
 0x3b8   : > { %1177 = vadd.xlane.f32.xlu1 %v1176_v52 }
 0x3c9   : > { %1403 = vrot.lane.b32.xlu1 %v2752_v40, %s2524_s25 }
 0x3e4   : > { %v1154_v54 = vpop.xlane.xlu1 %1153 }
 0x3e5   : > { %2438 = vrcp.f32 %v1154_v54  ;;  %v2406_v54 = vld [vmem:[%s2648_s29] sm:$0xff]  }
 0x3e6   : > { %2440 = vrcp.f32 %v1151_v53 }
 0x3e8   : > { %v1148_v20 = vpop.xlane.xlu1 %1147 }
 0x3e9   : > { %2442 = vrcp.f32 %v1148_v20  ;;  %v2407_v20 = vld [vmem:[%s2648_s29 + $0x8] sm:$0xff]  }
 0x3ef   : > { %v2439_v33 = vpop.eup %2438 }
 0x3f0   : > { %v2441_v36 = vpop.eup %2440  ;;  %v1196_v58 = vmul.f32 %v2439_v33, %v2857_v55 }
 0x3f1   : > { %v1195_v60 = vmul.f32 %v2441_v36, %v2845_v50 }
 0x3f2   : > { %v1207_v62 = vpack.c.bf16 %v1196_v58, %v1196_v58 }
 0x3f3   : > { %v2443_v57 = vpop.eup %2442 }
 0x3f4   : > { %v1194_v59 = vmul.f32 %v2443_v57, %v2861_v56 }
 0x3f6   : > { %v1206_v61 = vpack.c.bf16 %v1195_v60, %v1194_v59 }
 0x3f8   : > { %2258 = vmatprep.mubr.msk.bf16.mxu1 %vm1073_vm4, %v1206_v61 }
 0x3f9   : > { %2259 = vmatmul.mubr.msk.bf16.vlgmr.msra.gmra.mrb[8].mxu1 %vm1073_vm4, %v1207_v62 }
 0x3fa   : > { %2271 = vmatpush3.bf16.msra.mxu1 %v1340_v27 }
 0x407   : > { %v1163_v40 = vpop.xlane.xlu0 %1162 }
 0x408   : > { %v1172_v63 = vpop.xlane.xlu1 %1171  ;;  %2444 = vrcp.f32 %v1163_v40 }
 0x40b   : > { %v1157_v0 = vpop.xlane.xlu0 %1156 }
 0x40c   : > { %v1166_v1 = vpop.xlane.xlu1 %1165  ;;  %2446 = vrcp.f32 %v1157_v0 }
 0x40d   : > { %2448 = vrcp.f32 %v1166_v1 }
 0x410   : > { %v1160_v2 = vpop.xlane.xlu1 %1159 }
 0x411   : > { %v1169_v55 = vpop.xlane.xlu0 %1168  ;;  %2450 = vrcp.f32 %v1160_v2 }
 0x412   : > { %2452 = vrcp.f32 %v1169_v55  ;;  %v2445_v50 = vpop.eup %2444 }
 0x413   : > { %2454 = vrcp.f32 %v1172_v63  ;;  %v1199_v8 = vmul.f32 %v2445_v50, %v2871_v14 }
 0x415   : > { %v1209_v24 = vpack.c.bf16 %v1199_v8, %v1199_v8 }
 0x416   : > { %v2447_v56 = vpop.eup %2446 }
 0x417   : > { %v2449_v3 = vpop.eup %2448  ;;  %v1197_v11 = vmul.f32 %v2447_v56, %v2879_v21 }
 0x418   : > { %v1200_v13 = vmul.f32 %v2449_v3, %v2882_v23 }
 0x41b   : > { %v2451_v4 = vpop.eup %2450 }
 0x41c   : > { %v1181_v9 = vpop.xlane.xlu0 %1180  ;;  %v2453_v10 = vpop.eup %2452  ;;  %v1198_v12 = vmul.f32 %v2451_v4, %v2889_v30 }
 0x41d   : > { %v1201_v16 = vmul.f32 %v2453_v10, %v2891_v34  ;;  %v2455_v19 = vpop.eup %2454  ;;  %2456 = vrcp.f32 %v1181_v9 }
 0x41e   : > { %v1208_v17 = vpack.c.bf16 %v1198_v12, %v1197_v11  ;;  %v1202_v14 = vmul.f32 %v2455_v19, %v2873_v15 }
 0x41f   : > { %v1210_v22 = vpack.c.bf16 %v1201_v16, %v1200_v13 }
 0x420   : > { %v1175_v25 = vpop.xlane.xlu0 %1174  ;;  %2266 = vmatprep.mubr.msk.bf16.mxu0 %vm1073_vm4, %v1208_v17  ;;  %v1211_v23 = vpack.c.bf16 %v1202_v14, %v1202_v14 }
 0x421   : > { %2274 = vmatprep.mubr.msk.bf16.mxu1 %vm1073_vm4, %v1210_v22  ;;  %2267 = vmatmul.mubr.msk.bf16.vlgmr.msra.gmra.mrb[12].mxu0 %vm1073_vm4, %v1209_v24  ;;  %2458 = vrcp.f32 %v1175_v25  ;;  %v2137_v24 = vld [vmem:[%s3071_s14] ss:$0 sm:$0xff] }
 0x422   : > { %2279 = vmatpush3.bf16.msra.mxu0 %v1402_v47 }
 0x424   : > { %v1342_v21 = vpop.permute.xlu0 %1341 }
 0x425   : > { %v1351_v26 = vsel %vm1225_vm7, %v1342_v21, 0  ;;  %2324 = vmatprep.subr.msk.bf16.mxu1 %vm1225_vm7, %v1342_v21 }
 0x426   : > { %2273 = vmatpush3.bf16.msra.mxu1 %v1351_v26 }
 0x427   : > { %v2457_v15 = vpop.eup %2456  ;;  %2286 = vmatprep.subr.bf16.mxu1 %v2406_v54 }
 0x428   : > { %v1205_v37 = vmul.f32 %v2457_v15, %v2897_v41 }
 0x429   : > { %2275 = vmatmul.mubr.msk.bf16.vlgmr.msra.gmra.mrb[12].mxu1 %vm1073_vm4, %v1211_v23 }
 0x42a   : > { %v1213_v44 = vpack.c.bf16 %v1205_v37, %v1205_v37  ;;  %2287 = vmatpush3.bf16.msra.mxu1 %v2406_v54 }
 0x42b   : > { %v2459_v32 = vpop.eup %2458  ;;  %2288 = vmatprep.subr.bf16.mxu1 %v2407_v20 }
 0x42c   : > { %v1203_v38 = vmul.f32 %v2459_v32, %v2901_v43 }
 0x42e   : > { %2289 = vmatpush3.bf16.msra.mxu1 %v2407_v20 }
 0x445   : > { %v1178_v29 = vpop.xlane.xlu1 %1177 }
 0x446   : > { %2460 = vrcp.f32 %v1178_v29 }
 0x449   : > { %v1404_v30 = vpop.permute.xlu1 %1403 }
 0x44a   : > { %v1413_v31 = vsel %vm1225_vm7, %v1404_v30, 0  ;;  %2325 = vmatprep.subr.msk.bf16.mxu0 %vm1225_vm7, %v1404_v30 }
 0x44b   : > { %2281 = vmatpush3.bf16.msra.mxu0 %v1413_v31 }
 0x450   : > { %v2461_v34 = vpop.eup %2460 }
 0x451   : > { %v1204_v39 = vmul.f32 %v2461_v34, %v2912_v35 }
 0x453   : > { %v1212_v42 = vpack.c.bf16 %v1204_v39, %v1203_v38 }
 0x455   : > { %2282 = vmatprep.mubr.msk.bf16.mxu0 %vm1073_vm4, %v1212_v42 }
 0x456   : > { %2283 = vmatmul.mubr.msk.bf16.vlgmr.msra.gmra.mrb[16].mxu0 %vm1073_vm4, %v1213_v44 }
 0x4cc   : > { %v2260_v45 = vpop.f32.mrb[8].mxu1 }
 0x4cd   : > { %v1263_v46 = vpop.f32.mrb[9].mxu1 }
 0x4ce   : > { %v2261_v48 = vpop.f32.mrb[10].mxu1 }
 0x4cf   : > { %v1266_v49 = vpop.f32.mrb[11].mxu1 }
 0x4f4   : > { %v2268_v18 = vpop.f32.mrb[12].mxu0 }
 0x4f5   : > { %1470 = vrot.lane.b32.xlu1 %v2268_v18, %s2525_s18  ;;  %v1325_v27 = vpop.f32.mrb[13].mxu0 }
 0x4f6   : > { %v2269_v41 = vpop.f32.mrb[14].mxu0 }
 0x4f7   : > { %v1328_v43 = vpop.f32.mrb[15].mxu0 }
 0x4f8   : > { %v2389_v28 = vpack.i.bf16 %v1328_v43, %v1325_v27 }
 0x4fa   : > { %2390 = vrot.lane.b32.xlu0 %v2389_v28, %s2525_s18 }
 0x4fc   : > { %v2276_v51 = vpop.f32.mrb[12].mxu1 }
 0x4fd   : > { %1482 = vrot.lane.b32.xlu1 %v2276_v51, %s2526_s19  ;;  %v1387_v47 = vpop.f32.mrb[13].mxu1  ;;  %v2408_v51 = vld [vmem:[%s2665_s26] sm:$0xff]  }
 0x4fe   : > { %v2277_v35 = vpop.f32.mrb[14].mxu1  ;;  %2294 = vmatprep.subr.bf16.mxu0 %v2408_v51 }
 0x4ff   : > { %v1390_v52 = vpop.f32.mrb[15].mxu1  ;;  %2295 = vmatpush3.bf16.msra.mxu0 %v2408_v51 }
 0x500   : > { %v2394_v53 = vpack.i.bf16 %v1390_v52, %v1387_v47  ;;  %v2409_v47 = vld [vmem:[%s2665_s26 + $0x8] sm:$0xff]  }
 0x501   : > { %2296 = vmatprep.subr.bf16.mxu0 %v2409_v47 }
 0x502   : > { %2395 = vrot.lane.b32.xlu0 %v2394_v53, %s2526_s19 }
 0x503   : > { %2297 = vmatpush3.bf16.msra.mxu0 %v2409_v47 }
 0x529   : > { %v2284_v33 = vpop.f32.mrb[16].mxu0 }
 0x52a   : > { %v1449_v36 = vpop.f32.mrb[17].mxu0  ;;  %1494 = vrot.lane.b32.xlu1 %v2284_v33, %s2527_s22 }
 0x52b   : > { %v2285_v57 = vpop.f32.mrb[18].mxu0 }
 0x52c   : > { %v1452_v58 = vpop.f32.mrb[19].mxu0 }
 0x52d   : > { %v2399_v59 = vpack.i.bf16 %v1452_v58, %v1449_v36 }
 0x52f   : > { %2400 = vrot.lane.b32.xlu0 %v2399_v59, %s2527_s22 }
 0x567   : > { %v1471_v60 = vpop.permute.xlu1 %1470 }
 0x568   : > { %v1501_v50 = vsel %vm787_vm2, %v2260_v45, %v1471_v60  ;;  %v2142_v60 = vld [vmem:[%s3072_s28] ss:$0 sm:$0xff] }
 0x56c   : > { %v2391_v61 = vpop.permute.xlu0 %2390 }
 0x56d   : > { %v2393_v63 = vunpack.i.h.bf16 %v2391_v61  ;;  %v2392_v0 = vunpack.i.l.bf16 %v2391_v61 }
 0x56f   : > { %v1483_v62 = vpop.permute.xlu1 %1482  ;;  %v1500_v56 = vsel %vm787_vm2, %v1266_v49, %v2393_v63  ;;  %v1499_v4 = vsel %vm787_vm2, %v1263_v46, %v2392_v0 }
 0x570   : > { %v1505_v8 = vsel %vm1502_vm8, %v1501_v50, %v1483_v62 }
 0x574   : > { %v2396_v40 = vpop.permute.xlu0 %2395 }
 0x575   : > { %v2398_v1 = vunpack.i.h.bf16 %v2396_v40  ;;  %v2397_v2 = vunpack.i.l.bf16 %v2396_v40 }
 0x577   : > { %v1503_v11 = vsel %vm1502_vm8, %v1499_v4, %v2397_v2  ;;  %v1504_v12 = vsel %vm1502_vm8, %v1500_v56, %v2398_v1  ;;  %v2143_v1 = vld [vmem:[%s3073_s3] ss:$0 sm:$0xff] }
 0x59c   : > { %v1495_v55 = vpop.permute.xlu1 %1494 }
 0x59d   : > { %v1508_v13 = vsel %vm1073_vm4, %v1505_v8, %v1495_v55 }
 0x59e   : > { %v1510_v22 = vpack.c.bf16 %v1508_v13, %v1508_v13  ;;  %v2413_v13 = vld [vmem:[%s2675_s12 + $0x18] sm:$0xff]  }
 0x5a1   : > { %v2401_v3 = vpop.permute.xlu0 %2400 }
 0x5a2   : > { %v2403_v9 = vunpack.i.h.bf16 %v2401_v3  ;;  %v2402_v10 = vunpack.i.l.bf16 %v2401_v3 }
 0x5a4   : > { %v1506_v16 = vsel %vm1073_vm4, %v1503_v11, %v2402_v10  ;;  %v1507_v17 = vsel %vm1073_vm4, %v1504_v12, %v2403_v9  ;;  %v2410_v10 = vld [vmem:[%s2675_s12] sm:$0xff]   ;;  %v2411_v11 = vld [vmem:[%s2675_s12 + $0x8] sm:$0xff]   ;;  %v2412_v12 = vld [vmem:[%s2675_s12 + $0x10] sm:$0xff]  }
 0x5a5   : > { %v1509_v19 = vpack.c.bf16 %v1507_v17, %v1506_v16  ;;  %2302 = vmatprep.subr.bf16.mxu1 %v2410_v10  ;;  %v2144_v16 = vld [vmem:[%s3075_s15] ss:$0 sm:$0xff] }
 0x5a7   : > { %2290 = vmatprep.mubr.msk.bf16.mxu1 %vm688_vm1, %v1509_v19 }
 0x5a8   : > { %2291 = vmatmul.mubr.msk.bf16.vlgmr.msra.gmra.mrb[16].mxu1 %vm688_vm1, %v1510_v22 }
 0x5a9   : > { %2303 = vmatpush3.bf16.msra.mxu1 %v2410_v10 }
 0x5aa   : > { %2304 = vmatprep.subr.bf16.mxu1 %v2411_v11 }
 0x5ad   : > { %2305 = vmatpush3.bf16.msra.mxu1 %v2411_v11 }
 0x5ae   : > { %2306 = vmatprep.subr.bf16.mxu1 %v2412_v12 }
 0x5b1   : > { %2307 = vmatpush3.bf16.msra.mxu1 %v2412_v12 }
 0x5b2   : > { %2308 = vmatprep.subr.bf16.mxu1 %v2413_v13 }
 0x5b5   : > { %2309 = vmatpush3.bf16.msra.mxu1 %v2413_v13 }
 0x67b   : > { %v2292_v25 = vpop.f32.mrb[16].mxu1 }
 0x67c   : > { %v1574_v14 = vpop.f32.mrb[17].mxu1  ;;  %v1583_v21 = vadd.f32 %v2292_v25, %v2137_v24 }
 0x67d   : > { %v1575_v26 = vadd.f32 %v2137_v24, %v1574_v14  ;;  %v2293_v23 = vpop.f32.mrb[18].mxu1 }
 0x67e   : > { %v1577_v29 = vpop.f32.mrb[19].mxu1  ;;  %v1590_v34 = vadd.f32 %v1583_v21, %v2705_v7 }
 0x67f   : > { %v1578_v30 = vadd.f32 %v2137_v24, %v1577_v29  ;;  %v1588_v31 = vadd.f32 %v1575_v26, %v2699_v5 }
 0x680   : > { %v1599_v38 = vsel %vm688_vm1, %v1590_v34, 0.0 }
 0x681   : > { %v1593_v15 = vsel %vm688_vm1, %v1588_v31, 0.0  ;;  %v1589_v32 = vadd.f32 %v1578_v30, %v2702_v6 }
 0x682   : > { %1594 = vadd.xlane.f32.xlu0 %v1593_v15 }
 0x683   : > { %v1596_v37 = vsel %vm688_vm1, %v1589_v32, 0.0 }
 0x684   : > { %1597 = vadd.xlane.f32.xlu1 %v1596_v37 }
 0x686   : > { %1600 = vadd.xlane.f32.xlu0 %v1599_v38 }
 0x70f   : > { %v1595_v39 = vpop.xlane.xlu0 %1594 }
 0x710   : > { %v1603_v42 = vmul.f32 0.03125, %v1595_v39 }
 0x711   : > { %v1598_v44 = vpop.xlane.xlu1 %1597 }
 0x712   : > { %v1606_v45 = vsub.f32 %v1588_v31, %v1603_v42  ;;  %v1604_v5 = vmul.f32 0.03125, %v1598_v44 }
 0x713   : > { %v1601_v46 = vpop.xlane.xlu0 %1600 }
 0x714   : > { %v1607_v48 = vsub.f32 %v1589_v32, %v1604_v5  ;;  %v1605_v49 = vmul.f32 0.03125, %v1601_v46  ;;  %v1609_v6 = vmul.f32 %v1606_v45, %v1606_v45 }
 0x716   : > { %v1608_v18 = vsub.f32 %v1590_v34, %v1605_v49  ;;  %v1612_v7 = vsel %vm688_vm1, %v1609_v6, 0.0  ;;  %v1610_v27 = vmul.f32 %v1607_v48, %v1607_v48  ;;  %v2149_v49 = vld [vmem:[%s635_s20] ss:$0 sm:$0xff] }
 0x717   : > { %1613 = vadd.xlane.f32.xlu0 %v1612_v7 }
 0x718   : > { %v1615_v41 = vsel %vm688_vm1, %v1610_v27, 0.0  ;;  %v1611_v43 = vmul.f32 %v1608_v18, %v1608_v18 }
 0x719   : > { %1616 = vadd.xlane.f32.xlu1 %v1615_v41 }
 0x71a   : > { %v1618_v28 = vsel %vm688_vm1, %v1611_v43, 0.0 }
 0x71b   : > { %1619 = vadd.xlane.f32.xlu0 %v1618_v28 }
 0x7a4   : > { %v1614_v35 = vpop.xlane.xlu0 %1613 }
 0x7a5   : > { %v1621_v52 = vmul.f32 0.03125, %v1614_v35 }
 0x7a6   : > { %v1617_v53 = vpop.xlane.xlu1 %1616 }
 0x7a7   : > { %v1624_v54 = vadd.f32 1e-05, %v1621_v52  ;;  %v1622_v20 = vmul.f32 0.03125, %v1617_v53 }
 0x7a8   : > { %v1620_v33 = vpop.xlane.xlu0 %1619 }
 0x7a9   : > { %2462 = vrsqrt.f32 %v1624_v54  ;;  %v1625_v36 = vadd.f32 1e-05, %v1622_v20  ;;  %v1623_v57 = vmul.f32 0.03125, %v1620_v33 }
 0x7ab   : > { %2464 = vrsqrt.f32 %v1625_v36  ;;  %v1626_v58 = vadd.f32 1e-05, %v1623_v57 }
 0x7ad   : > { %2466 = vrsqrt.f32 %v1626_v58 }
 0x7b3   : > { %v2463_v59 = vpop.eup %2462 }
 0x7b4   : > { %v1630_v61 = vmul.f32 %v2463_v59, %v1606_v45 }
 0x7b5   : > { %v2465_v62 = vpop.eup %2464 }
 0x7b6   : > { %v1631_v40 = vmul.f32 %v2465_v62, %v1607_v48  ;;  %v1639_v63 = vmul.f32 %v2142_v60, %v1630_v61 }
 0x7b7   : > { %v2467_v0 = vpop.eup %2466 }
 0x7b8   : > { %v1632_v2 = vmul.f32 %v2467_v0, %v1608_v18  ;;  %v1640_v55 = vmul.f32 %v2142_v60, %v1631_v40  ;;  %v1648_v50 = vadd.f32 %v2143_v1, %v1639_v63 }
 0x7ba   : > { %v1649_v56 = vadd.f32 %v2143_v1, %v1640_v55  ;;  %v1641_v3 = vmul.f32 %v2142_v60, %v1632_v2 }
 0x7bc   : > { %v1651_v4 = vpack.c.bf16 %v1649_v56, %v1648_v50  ;;  %v1650_v8 = vadd.f32 %v2143_v1, %v1641_v3 }
 0x7be   : > { %2298 = vmatprep.mubr.msk.bf16.mxu0 %vm688_vm1, %v1651_v4  ;;  %v1652_v9 = vpack.c.bf16 %v1650_v8, %v1650_v8 }
 0x7c0   : > { %2299 = vmatmul.mubr.msk.bf16.vlgmr.msra.gmra.mrb[20].mxu0 %vm688_vm1, %v1652_v9 }
 0x893   : > { %v2300_v17 = vpop.f32.mrb[20].mxu0 }
 0x894   : > { %v1725_v19 = vadd.f32 %v2300_v17, %v2144_v16  ;;  %v1716_v22 = vpop.f32.mrb[21].mxu0 }
 0x895   : > { %v1717_v24 = vadd.f32 %v2144_v16, %v1716_v22  ;;  %v2301_v25 = vpop.f32.mrb[22].mxu0  ;;  %v2157_v22 = vld [vmem:[%s641_s7] ss:$0 sm:$0xff] }
 0x896   : > { %v1735_v14 = vmul.f32 0.70710677, %v1725_v19  ;;  %v1719_v21 = vpop.f32.mrb[23].mxu0  ;;  %v1732_v37 = vmul.f32 0.5, %v1725_v19 }
 0x897   : > { %v1733_v26 = vmul.f32 0.70710677, %v1717_v24  ;;  %v1720_v23 = vadd.f32 %v2144_v16, %v1719_v21  ;;  %v1730_v38 = vmul.f32 0.5, %v1717_v24  ;;  %v2156_v16 = vld [vmem:[%s638_s1] ss:$0 sm:$0xff] }
 0x898   : > { %2468 = verf.f32 %v1735_v14 }
 0x899   : > { %2470 = verf.f32 %v1733_v26  ;;  %v1734_v29 = vmul.f32 0.70710677, %v1720_v23  ;;  %v1731_v39 = vmul.f32 0.5, %v1720_v23 }
 0x89b   : > { %2472 = verf.f32 %v1734_v29 }
 0x8a2   : > { %v2469_v30 = vpop.eup %2468 }
 0x8a3   : > { %v2471_v31 = vpop.eup %2470  ;;  %v1741_v15 = vadd.f32 1.0, %v2469_v30 }
 0x8a4   : > { %v1739_v32 = vadd.f32 1.0, %v2471_v31 }
 0x8a5   : > { %v2473_v34 = vpop.eup %2472  ;;  %v1744_v44 = vmul.f32 %v1741_v15, %v1732_v37 }
 0x8a6   : > { %v1740_v42 = vadd.f32 1.0, %v2473_v34  ;;  %v1742_v45 = vmul.f32 %v1739_v32, %v1730_v38 }
 0x8a7   : > { %v1746_v48 = vpack.c.bf16 %v1744_v44, %v1744_v44 }
 0x8a8   : > { %v1743_v5 = vmul.f32 %v1740_v42, %v1731_v39 }
 0x8aa   : > { %v1745_v46 = vpack.c.bf16 %v1743_v5, %v1742_v45 }
 0x8ac   : > { %2310 = vmatprep.mubr.msk.bf16.mxu1 %vm1786_vm9, %v1745_v46 }
 0x8ad   : > { %2311 = vmatmul.mubr.msk.bf16.vlgmr.msra.gmra.mrb[20].mxu1 %vm1786_vm9, %v1746_v48 }
 0x980   : > { %v2312_v6 = vpop.f32.mrb[20].mxu1 }
 0x981   : > { %v1827_v18 = vpop.f32.mrb[21].mxu1  ;;  %v1836_v7 = vadd.f32 %v2312_v6, %v2149_v49 }
 0x982   : > { %v1828_v27 = vadd.f32 %v2149_v49, %v1827_v18  ;;  %v2313_v41 = vpop.f32.mrb[22].mxu1 }
 0x983   : > { %v1830_v43 = vpop.f32.mrb[23].mxu1  ;;  %v1843_v52 = vadd.f32 %v1836_v7, %v1650_v8 }
 0x984   : > { %v1831_v28 = vadd.f32 %v2149_v49, %v1830_v43  ;;  %v1841_v51 = vadd.f32 %v1828_v27, %v1648_v50 }
 0x985   : > { %v1852_v54 = vsel %vm688_vm1, %v1843_v52, 0.0 }
 0x986   : > { %v1846_v47 = vsel %vm688_vm1, %v1841_v51, 0.0  ;;  %v1842_v35 = vadd.f32 %v1831_v28, %v1649_v56 }
 0x987   : > { %1847 = vadd.xlane.f32.xlu1 %v1846_v47 }
 0x988   : > { %v1849_v53 = vsel %vm688_vm1, %v1842_v35, 0.0 }
 0x989   : > { %1850 = vadd.xlane.f32.xlu0 %v1849_v53 }
 0x98b   : > { %1853 = vadd.xlane.f32.xlu1 %v1852_v54 }
 0xa14   : > { %v1848_v20 = vpop.xlane.xlu1 %1847 }
 0xa15   : > { %v1855_v33 = vmul.f32 0.03125, %v1848_v20 }
 0xa16   : > { %v1851_v36 = vpop.xlane.xlu0 %1850 }
 0xa17   : > { %v1858_v57 = vsub.f32 %v1841_v51, %v1855_v33  ;;  %v1856_v58 = vmul.f32 0.03125, %v1851_v36 }
 0xa18   : > { %v1854_v59 = vpop.xlane.xlu1 %1853 }
 0xa19   : > { %v1859_v60 = vsub.f32 %v1842_v35, %v1856_v58  ;;  %v1857_v61 = vmul.f32 0.03125, %v1854_v59  ;;  %v1861_v62 = vmul.f32 %v1858_v57, %v1858_v57 }
 0xa1b   : > { %v1860_v40 = vsub.f32 %v1843_v52, %v1857_v61  ;;  %v1864_v63 = vsel %vm688_vm1, %v1861_v62, 0.0  ;;  %v1862_v0 = vmul.f32 %v1859_v60, %v1859_v60 }
 0xa1c   : > { %1865 = vadd.xlane.f32.xlu0 %v1864_v63 }
 0xa1d   : > { %v1867_v1 = vsel %vm688_vm1, %v1862_v0, 0.0  ;;  %v1863_v2 = vmul.f32 %v1860_v40, %v1860_v40 }
 0xa1e   : > { %1868 = vadd.xlane.f32.xlu1 %v1867_v1 }
 0xa1f   : > { %v1870_v55 = vsel %vm688_vm1, %v1863_v2, 0.0 }
 0xa20   : > { %1871 = vadd.xlane.f32.xlu0 %v1870_v55 }
 0xaa9   : > { %v1866_v50 = vpop.xlane.xlu0 %1865 }
 0xaaa   : > { %v1873_v56 = vmul.f32 0.03125, %v1866_v50 }
 0xaab   : > { %v1869_v3 = vpop.xlane.xlu1 %1868 }
 0xaac   : > { %v1876_v4 = vadd.f32 1e-05, %v1873_v56  ;;  %v1874_v8 = vmul.f32 0.03125, %v1869_v3 }
 0xaad   : > { %v1872_v9 = vpop.xlane.xlu0 %1871 }
 0xaae   : > { %2474 = vrsqrt.f32 %v1876_v4  ;;  %v1877_v10 = vadd.f32 1e-05, %v1874_v8  ;;  %v1875_v11 = vmul.f32 0.03125, %v1872_v9 }
 0xab0   : > { %2476 = vrsqrt.f32 %v1877_v10  ;;  %v1878_v12 = vadd.f32 1e-05, %v1875_v11 }
 0xab2   : > { %2478 = vrsqrt.f32 %v1878_v12 }
 0xab8   : > { %v2475_v13 = vpop.eup %2474 }
 0xab9   : > { %v1882_v17 = vmul.f32 %v2475_v13, %v1858_v57 }
 0xaba   : > { %v2477_v19 = vpop.eup %2476 }
 0xabb   : > { %v1891_v24 = vmul.f32 %v2156_v16, %v1882_v17  ;;  %v1883_v25 = vmul.f32 %v2477_v19, %v1859_v60 }
 0xabc   : > { %v2479_v14 = vpop.eup %2478 }
 0xabd   : > { %v1900_v21 = vadd.f32 %v2157_v22, %v1891_v24  ;;  %v1892_v26 = vmul.f32 %v2156_v16, %v1883_v25  ;;  %v1884_v23 = vmul.f32 %v2479_v14, %v1860_v40 }
 0xabf   : > { %vm1903_vm10 = vcmp.ne.f32.partialorder %v1900_v21, %v1900_v21  ;;  %v1901_v29 = vadd.f32 %v2157_v22, %v1892_v26  ;;  %v1893_v30 = vmul.f32 %v2156_v16, %v1884_v23 }
 0xac0   : > { %v1906_v31 = vsel %vm1903_vm10, 0.0, %v1900_v21 }
 0xac1   : > { %1909 = vst.msk [vmem:[%s2692_s8] sm:$0xff] %vm688_vm1, %v1906_v31  ;;  %vm1904_vm11 = vcmp.ne.f32.partialorder %v1901_v29, %v1901_v29  ;;  %v1902_v15 = vadd.f32 %v2157_v22, %v1893_v30 }
 0xac2   : > { %v1907_v32 = vsel %vm1904_vm11, 0.0, %v1901_v29 }
 0xac3   : > { %1910 = vst.msk [vmem:[%s2692_s8 + $0x8] sm:$0xff] %vm688_vm1, %v1907_v32  ;;  %vm1905_vm12 = vcmp.ne.f32.partialorder %v1902_v15, %v1902_v15 }
 0xac4   : > { %v1908_v34 = vsel %vm1905_vm12, 0.0, %v1902_v15 }
 0xac5   : > { %1911 = vst.msk [vmem:[%s2692_s8 + $0x10] sm:$0xff] %vm688_vm1, %v1908_v34 }
 0xac6 PF: > { %s3077_s7 = sld [smem:[#allocation5_spill]]  ;;  %s3078_s25 = sld [smem:[#allocation3_spill]] }
 0xac7   : > { %s3079_s26 = sld [smem:[#allocation4_spill]]  ;;  %s3080_s27 = sld [smem:[#allocation6_spill]] }
 0xac8   : > { %s3081_s28 = sld [smem:[#allocation7_spill]] }
 0xacc   : > { %s23_s29 = sadd.s32 1, %s3077_s7  }
 0xacd   : > { %p20_p8 = scmp.ge.s32.totalorder %s23_s29, 6  }
 0xacf   :  { %22 = sbr.rel (!%p20_p8) target bundleno = 8 (0x8), region = 142 }

</bundles_post_ra>
